<compile_context>
chip_gen: v6e
topology: v6e:2x2x1
jax: 0.10.0
libtpu: 0.0.40
codegen_flags: <defaults>
</compile_context>

<pallas_src>
import jax
import jax.numpy as jnp
import numpy as np
from jax.experimental import pallas as pl
from jax.experimental.pallas import tpu as pltpu


def _round_up(x, m):
    return (x + m - 1) // m * m


def _upsample_conv_kernel(x_ref, top_ref, bot_ref, w_ref, b_ref, o_ref, q2_ref):
    """Subpixel (4-phase) 3x3 conv of the nearest-2x upsample of one row tile.

    x_ref:   (1, TH, W+2, C)    original-resolution rows, W zero-padded by 1
    top_ref: (1, 1, W+2, C)     row above the tile (zeros at the frame edge)
    bot_ref: (1, 1, W+2, C)     row below the tile (zeros at the frame edge)
    w_ref:   (2, 4C, 2C)        per-row-phase stacked weights; rows are the
                                4 folded 2x2 taps (K), cols the 2 column
                                phases x C output channels (N)
    b_ref:   (1, 2C)            bias duplicated for both column phases (f32)
    o_ref:   (1, TH, 2, W, 2C)  o[0,t,a,j,b*C+c] = y_upsampled[2t+a, 2j+b, c]
    q2_ref:  (TH+1, Wq, 4C)     VMEM scratch: 2x2 im2col slab (Wq >= W+1)
    """
    _, TH, _, W, C2 = o_ref.shape
    C = C2 // 2
    Wq = q2_ref.shape[1]

    # ---- build the 2x2 im2col slab once per tile -------------------------
    # Q2[r, j, (ry*2+rx)*C : +C] = xs[r+ry, j+rx, :] where xs is the haloed
    # tile [top ; x rows ; bot] at W-padded resolution.  Only columns 0..W
    # are written; columns W+1..Wq-1 are alignment padding (never read back).
    for rx in range(2):
        body = x_ref[0, :, rx:rx + W + 1, :]                 # (TH, W+1, C)
        top = top_ref[0, :, rx:rx + W + 1, :]                # (1,  W+1, C)
        bot = bot_ref[0, :, rx:rx + W + 1, :]                # (1,  W+1, C)
        b0 = slice((0 * 2 + rx) * C, (0 * 2 + rx + 1) * C)   # tap (ry=0, rx)
        b1 = slice((1 * 2 + rx) * C, (1 * 2 + rx + 1) * C)   # tap (ry=1, rx)
        q2_ref[0:1, 0:W + 1, b0] = top
        q2_ref[1:TH + 1, 0:W + 1, b0] = body
        q2_ref[0:TH, 0:W + 1, b1] = body
        q2_ref[TH:TH + 1, 0:W + 1, b1] = bot

    bias2 = b_ref[...]                                       # (1, 2C) f32

    # ---- one K=4C, N=2C matmul per output row phase ----------------------
    for a in range(2):
        # Free Ref-view row slice of the slab; Wq % 8 == 0 keeps the
        # (TH, Wq, 4C) -> (TH*Wq, 4C) collapse layout-trivial.
        op = q2_ref[a:a + TH, :, :].reshape(TH * Wq, 4 * C)
        y = jnp.dot(op, w_ref[a], preferred_element_type=jnp.float32) + bias2
        y = y.reshape(TH, Wq, 2 * C)
        # Column phase b=0 lives at slab column j, b=1 at slab column j+1.
        o_ref[0, :, a, :, 0:C] = y[:, 0:W, 0:C].astype(o_ref.dtype)
        o_ref[0, :, a, :, C:2 * C] = y[:, 1:W + 1, C:2 * C].astype(o_ref.dtype)


def _fold_weights(weight_oihw):
    """OIHW (C,C,3,3) -> phase-folded (4, 4, Cin, Cout) 2x2 taps.

    Output phase (a,b) of the upsampled image reads original rows (i-1+a, i+a)
    and cols (j-1+b, j+b); each of the nine 3x3 taps collapses onto one of
    those 2x2 taps (the fold is separable in rows/cols).
    """
    w_hwio = jnp.transpose(weight_oihw, (2, 3, 1, 0))          # (3, 3, Cin, Cout)
    # F[a][kh, ry] = 1 iff 3x3 tap kh of row-phase a lands on 2x2 row tap ry.
    F = jnp.array([[[1., 0.], [0., 1.], [0., 1.]],             # a=0: rows (i-1, i)
                   [[1., 0.], [1., 0.], [0., 1.]]],            # a=1: rows (i, i+1)
                  dtype=w_hwio.dtype)                          # (2, 3, 2)
    w_fold = jnp.einsum('ahr,bws,hwio->abrsio', F, F, w_hwio)  # (2,2,2,2,C,C)
    C = w_hwio.shape[-1]
    return w_fold.reshape(4, 4, C, C)


def _stack_weights(w_fold, C):
    """(4,4,Cin,Cout) -> (2, 4C, 2C): K = 4 folded taps x Cin, N = 2 col phases x Cout."""
    ws = w_fold.reshape(2, 2, 4, C, C)                 # [a, b, tap, Cin, Cout]
    ws = jnp.transpose(ws, (0, 2, 3, 1, 4))            # [a, tap, Cin, b, Cout]
    return ws.reshape(2, 4 * C, 2 * C)


def _vmem_limit_bytes():
    """Generation-aware scoped-VMEM limit (conservative fallback = v7x 64 MiB)."""
    try:
        cap = int(pltpu.get_tpu_info().vmem_capacity_bytes)
    except Exception:
        cap = 64 * 1024 * 1024
    return max(32 * 1024 * 1024, min(cap * 3 // 4, 100 * 1024 * 1024))


def _pick_tile_h(H, W, C, N, in_bytes, out_bytes, vmem_limit):
    """Largest row-tile TH dividing H whose per-step VMEM footprint fits."""
    Wq = _round_up(W + 1, 8)
    fixed = (2 * (4 * C) * (2 * C) * in_bytes * 2      # stacked weights, double-buffered
             + 2 * (W + 2) * C * in_bytes * 2 * 2      # top/bot halo blocks, double-buffered
             + Wq * 4 * C * in_bytes                   # im2col slab's extra (+1) row
             + 4 * C * 4)                              # bias
    per_row = ((W + 2) * C * in_bytes * 2              # input tile (double-buffered)
               + 2 * W * 2 * C * out_bytes * 2         # output tile (double-buffered)
               + Wq * 4 * C * in_bytes                 # im2col scratch
               + Wq * 4 * C * in_bytes                 # live matmul operand (conservative)
               + Wq * 2 * C * 4 * 2                    # f32 matmul result + headroom
               + 2 * W * C * (4 + out_bytes))          # slice / cast temporaries
    budget = int(vmem_limit * 0.85) - fixed
    rows_cap = H if N > 1 else max(H // 2, 1)          # megacore insurance only at N == 1
    best = 1
    for d in range(1, H + 1):
        if H % d == 0 and d <= rows_cap and d * per_row <= budget:
            best = d
    # Note: if H is prime this degenerates to TH = 1 (correct, just slow).
    return best


def upsample_forward(x_nchw, weight_oihw=None, bias=None, with_conv=True,
                     compute_dtype=None):
    """Matches PyTorch Upsample.forward: nearest-2x upsample (+ optional conv).

    x_nchw:      (N, C, H, W)
    weight_oihw: (C, C, 3, 3)   PyTorch Conv2d weight layout
    bias:        (C,)
    compute_dtype: matmul operand dtype (e.g. jnp.bfloat16 for the MXU-native
                   path on v5e/v6e/v7x); accumulation is always f32.  Default
                   keeps x's dtype so numerics match the PyTorch module.
    returns      (N, C, 2H, 2W) in x's dtype.
    """
    N, C, H, W = x_nchw.shape
    if not with_conv:
        # Pure index duplication -- no arithmetic, leave it to XLA.
        return jnp.repeat(jnp.repeat(x_nchw, 2, axis=2), 2, axis=3)

    out_dtype = x_nchw.dtype
    cdt = jnp.dtype(compute_dtype) if compute_dtype is not None else jnp.dtype(out_dtype)
    in_bytes = cdt.itemsize
    out_bytes = jnp.dtype(out_dtype).itemsize
    vmem_limit = _vmem_limit_bytes()
    TH = _pick_tile_h(H, W, C, N, in_bytes, out_bytes, vmem_limit)
    nI = H // TH
    Wp = W + 2
    Wq = _round_up(W + 1, 8)

    # Layout + zero-pad at ORIGINAL resolution only; the 4x-sized upsampled /
    # padded tensor is never built in HBM on the input side.
    x_nhwc = jnp.transpose(x_nchw, (0, 2, 3, 1))                       # (N, H, W, C)
    x_wpad = jnp.pad(x_nhwc, ((0, 0), (0, 0), (1, 1), (0, 0))).astype(cdt)

    # Per-tile 1-row halos (tiny side arrays: N * nI rows each).
    zrow = jnp.zeros((N, 1, Wp, C), cdt)
    top_rows = x_wpad[:, TH - 1:H - 1:TH]                              # rows i*TH-1, i>=1
    bot_rows = x_wpad[:, TH:H:TH]                                      # rows (i+1)*TH, i<nI-1
    top_halo = jnp.concatenate([zrow, top_rows], axis=1)               # (N, nI, Wp, C)
    bot_halo = jnp.concatenate([bot_rows, zrow], axis=1)               # (N, nI, Wp, C)

    w_fold = _fold_weights(weight_oihw.astype(jnp.float32))            # f32 fold
    w_stack = _stack_weights(w_fold, C).astype(cdt)                    # (2, 4C, 2C)
    bias2 = jnp.concatenate([bias, bias]).reshape(1, 2 * C).astype(jnp.float32)

    out5 = pl.pallas_call(
        _upsample_conv_kernel,
        out_shape=jax.ShapeDtypeStruct((N, H, 2, W, 2 * C), out_dtype),
        grid_spec=pltpu.PrefetchScalarGridSpec(
            num_scalar_prefetch=0,
            grid=(N, nI),
            in_specs=[
                pl.BlockSpec((1, TH, Wp, C), lambda n, i: (n, i, 0, 0)),
                pl.BlockSpec((1, 1, Wp, C), lambda n, i: (n, i, 0, 0)),
                pl.BlockSpec((1, 1, Wp, C), lambda n, i: (n, i, 0, 0)),
                pl.BlockSpec((2, 4 * C, 2 * C), lambda n, i: (0, 0, 0)),
                pl.BlockSpec((1, 2 * C), lambda n, i: (0, 0)),
            ],
            out_specs=pl.BlockSpec((1, TH, 2, W, 2 * C),
                                   lambda n, i: (n, i, 0, 0, 0)),
            scratch_shapes=[pltpu.VMEM((TH + 1, Wq, 4 * C), cdt)],
        ),
        compiler_params=pltpu.CompilerParams(
            dimension_semantics=("parallel", "parallel"),
            vmem_limit_bytes=vmem_limit,
        ),
    )(x_wpad, top_halo, bot_halo, w_stack, bias2)

    # (N, H, 2, W, 2C) row-major flattening IS the interleaved NHWC image:
    # both reshapes below are free adjacent-dim merges; the only HBM pass over
    # the 4x-sized output is a single standard NHWC -> NCHW transpose.
    out_nhwc = out5.reshape(N, 2 * H, 2 * W, C)
    return jnp.transpose(out_nhwc, (0, 3, 1, 2))


if __name__ == "__main__":
    # Deterministic synthetic params/inputs (Conv2d(in_channels, in_channels, 3)).
    N, C, H, W = 2, 4, 16, 16
    key = jax.random.PRNGKey(0)
    kx, kw, kb = jax.random.split(key, 3)
    x = jax.random.normal(kx, (N, C, H, W), dtype=jnp.float32)
    weight = jax.random.normal(kw, (C, C, 3, 3), dtype=jnp.float32) * 0.1
    bias = jax.random.normal(kb, (C,), dtype=jnp.float32) * 0.1

    # Pure-JAX reference (nearest 2x upsample + XLA conv).
    x_up_ref = jnp.repeat(jnp.repeat(x, 2, axis=2), 2, axis=3)
    ref = jax.lax.conv_general_dilated(
        x_up_ref, weight, window_strides=(1, 1), padding=((1, 1), (1, 1)),
        dimension_numbers=("NCHW", "OIHW", "NCHW"),
    ) + bias[None, :, None, None]

    # f32 operand path (default: matches PyTorch numerics).
    out_f32 = jax.block_until_ready(
        upsample_forward(x, weight, bias, with_conv=True,
                         compute_dtype=jnp.float32))
    assert out_f32.shape == (N, C, 2 * H, 2 * W), out_f32.shape
    np.testing.assert_allclose(np.asarray(out_f32), np.asarray(ref),
                               rtol=1e-3, atol=1e-3)

    # bf16 operand path (MXU-native on v5e/v6e/v7x), f32 accumulation.
    out_bf16 = jax.block_until_ready(
        upsample_forward(x, weight, bias, with_conv=True,
                         compute_dtype=jnp.bfloat16))
    np.testing.assert_allclose(np.asarray(out_bf16), np.asarray(ref),
                               rtol=3e-2, atol=3e-2)

    # with_conv=False path (pure data movement, stays in XLA).
    out_nc = jax.block_until_ready(upsample_forward(x, with_conv=False))
    np.testing.assert_allclose(np.asarray(out_nc), np.asarray(x_up_ref))

    print("KERNEL_OK")
</pallas_src>

<mosaic_0001>
module attributes {stable_mosaic.version = 11 : i64} {
  func.func @_upsample_conv_kernel(%arg0: i32, %arg1: i32, %arg2: memref<1x16x18x4xf32, #tpu.memory_space<vmem>>, %arg3: memref<1x1x18x4xf32, #tpu.memory_space<vmem>>, %arg4: memref<1x1x18x4xf32, #tpu.memory_space<vmem>>, %arg5: memref<2x16x8xf32, #tpu.memory_space<vmem>>, %arg6: memref<1x8xf32, #tpu.memory_space<vmem>>, %arg7: memref<1x16x2x16x8xf32, #tpu.memory_space<vmem>>, %arg8: memref<17x24x16xf32, #tpu.memory_space<vmem>>) attributes {dimension_semantics = [#tpu.dimension_semantics<parallel>, #tpu.dimension_semantics<parallel>], iteration_bounds = array<i64: 2, 1>, scalar_prefetch = 0 : i64, scratch_operands = 1 : i64, tpu.core_type = #tpu.core_type<tc>, window_params = [{transform_indices = @transform_0, window_bounds = array<i64: 1, 16, 18, 4>}, {transform_indices = @transform_1, window_bounds = array<i64: 1, 1, 18, 4>}, {transform_indices = @transform_2, window_bounds = array<i64: 1, 1, 18, 4>}, {pipeline_mode = #tpu.pipeline_mode<synchronous>, transform_indices = @transform_3, window_bounds = array<i64: 2, 16, 8>}, {pipeline_mode = #tpu.pipeline_mode<synchronous>, transform_indices = @transform_4, window_bounds = array<i64: 1, 8>}, {transform_indices = @transform_5, window_bounds = array<i64: 1, 16, 2, 16, 8>}]} {
    %c0 = arith.constant 0 : index
    %c0_0 = arith.constant 0 : index
    %c0_1 = arith.constant 0 : index
    %c0_2 = arith.constant 0 : index
    %0 = vector.load %arg2[%c0, %c0_0, %c0_1, %c0_2] : memref<1x16x18x4xf32, #tpu.memory_space<vmem>>, vector<1x16x17x4xf32>
    %1 = vector.shape_cast %0 : vector<1x16x17x4xf32> to vector<16x17x4xf32>
    %c0_3 = arith.constant 0 : index
    %c0_4 = arith.constant 0 : index
    %c0_5 = arith.constant 0 : index
    %c0_6 = arith.constant 0 : index
    %2 = vector.load %arg3[%c0_3, %c0_4, %c0_5, %c0_6] : memref<1x1x18x4xf32, #tpu.memory_space<vmem>>, vector<1x1x17x4xf32>
    %3 = vector.shape_cast %2 : vector<1x1x17x4xf32> to vector<1x17x4xf32>
    %c0_7 = arith.constant 0 : index
    %c0_8 = arith.constant 0 : index
    %c0_9 = arith.constant 0 : index
    %c0_10 = arith.constant 0 : index
    %4 = vector.load %arg4[%c0_7, %c0_8, %c0_9, %c0_10] : memref<1x1x18x4xf32, #tpu.memory_space<vmem>>, vector<1x1x17x4xf32>
    %5 = vector.shape_cast %4 : vector<1x1x17x4xf32> to vector<1x17x4xf32>
    %c0_11 = arith.constant 0 : index
    %c0_12 = arith.constant 0 : index
    %c0_13 = arith.constant 0 : index
    %6 = vector.load %arg8[%c0_11, %c0_12, %c0_13] : memref<17x24x16xf32, #tpu.memory_space<vmem>>, vector<1x17x4xf32>
    tpu.vector_store %arg8[%c0_11, %c0_12, %c0_13], %3 {strides = array<i32>} : memref<17x24x16xf32, #tpu.memory_space<vmem>>, vector<1x17x4xf32>,
    %c1 = arith.constant 1 : index
    %c0_14 = arith.constant 0 : index
    %c0_15 = arith.constant 0 : index
    %7 = vector.load %arg8[%c1, %c0_14, %c0_15] : memref<17x24x16xf32, #tpu.memory_space<vmem>>, vector<16x17x4xf32>
    tpu.vector_store %arg8[%c1, %c0_14, %c0_15], %1 {strides = array<i32>} : memref<17x24x16xf32, #tpu.memory_space<vmem>>, vector<16x17x4xf32>,
    %c0_16 = arith.constant 0 : index
    %c0_17 = arith.constant 0 : index
    %c8 = arith.constant 8 : index
    %8 = vector.load %arg8[%c0_16, %c0_17, %c8] : memref<17x24x16xf32, #tpu.memory_space<vmem>>, vector<16x17x4xf32>
    tpu.vector_store %arg8[%c0_16, %c0_17, %c8], %1 {strides = array<i32>} : memref<17x24x16xf32, #tpu.memory_space<vmem>>, vector<16x17x4xf32>,
    %c16 = arith.constant 16 : index
    %c0_18 = arith.constant 0 : index
    %c8_19 = arith.constant 8 : index
    %9 = vector.load %arg8[%c16, %c0_18, %c8_19] : memref<17x24x16xf32, #tpu.memory_space<vmem>>, vector<1x17x4xf32>
    tpu.vector_store %arg8[%c16, %c0_18, %c8_19], %5 {strides = array<i32>} : memref<17x24x16xf32, #tpu.memory_space<vmem>>, vector<1x17x4xf32>,
    %c0_20 = arith.constant 0 : index
    %c0_21 = arith.constant 0 : index
    %c1_22 = arith.constant 1 : index
    %c0_23 = arith.constant 0 : index
    %10 = vector.load %arg2[%c0_20, %c0_21, %c1_22, %c0_23] : memref<1x16x18x4xf32, #tpu.memory_space<vmem>>, vector<1x16x17x4xf32>
    %11 = vector.shape_cast %10 : vector<1x16x17x4xf32> to vector<16x17x4xf32>
    %c0_24 = arith.constant 0 : index
    %c0_25 = arith.constant 0 : index
    %c1_26 = arith.constant 1 : index
    %c0_27 = arith.constant 0 : index
    %12 = vector.load %arg3[%c0_24, %c0_25, %c1_26, %c0_27] : memref<1x1x18x4xf32, #tpu.memory_space<vmem>>, vector<1x1x17x4xf32>
    %13 = vector.shape_cast %12 : vector<1x1x17x4xf32> to vector<1x17x4xf32>
    %c0_28 = arith.constant 0 : index
    %c0_29 = arith.constant 0 : index
    %c1_30 = arith.constant 1 : index
    %c0_31 = arith.constant 0 : index
    %14 = vector.load %arg4[%c0_28, %c0_29, %c1_30, %c0_31] : memref<1x1x18x4xf32, #tpu.memory_space<vmem>>, vector<1x1x17x4xf32>
    %15 = vector.shape_cast %14 : vector<1x1x17x4xf32> to vector<1x17x4xf32>
    %c0_32 = arith.constant 0 : index
    %c0_33 = arith.constant 0 : index
    %c4 = arith.constant 4 : index
    %16 = vector.load %arg8[%c0_32, %c0_33, %c4] : memref<17x24x16xf32, #tpu.memory_space<vmem>>, vector<1x17x4xf32>
    tpu.vector_store %arg8[%c0_32, %c0_33, %c4], %13 {strides = array<i32>} : memref<17x24x16xf32, #tpu.memory_space<vmem>>, vector<1x17x4xf32>,
    %c1_34 = arith.constant 1 : index
    %c0_35 = arith.constant 0 : index
    %c4_36 = arith.constant 4 : index
    %17 = vector.load %arg8[%c1_34, %c0_35, %c4_36] : memref<17x24x16xf32, #tpu.memory_space<vmem>>, vector<16x17x4xf32>
    tpu.vector_store %arg8[%c1_34, %c0_35, %c4_36], %11 {strides = array<i32>} : memref<17x24x16xf32, #tpu.memory_space<vmem>>, vector<16x17x4xf32>,
    %c0_37 = arith.constant 0 : index
    %c0_38 = arith.constant 0 : index
    %c12 = arith.constant 12 : index
    %18 = vector.load %arg8[%c0_37, %c0_38, %c12] : memref<17x24x16xf32, #tpu.memory_space<vmem>>, vector<16x17x4xf32>
    tpu.vector_store %arg8[%c0_37, %c0_38, %c12], %11 {strides = array<i32>} : memref<17x24x16xf32, #tpu.memory_space<vmem>>, vector<16x17x4xf32>,
    %c16_39 = arith.constant 16 : index
    %c0_40 = arith.constant 0 : index
    %c12_41 = arith.constant 12 : index
    %19 = vector.load %arg8[%c16_39, %c0_40, %c12_41] : memref<17x24x16xf32, #tpu.memory_space<vmem>>, vector<1x17x4xf32>
    tpu.vector_store %arg8[%c16_39, %c0_40, %c12_41], %15 {strides = array<i32>} : memref<17x24x16xf32, #tpu.memory_space<vmem>>, vector<1x17x4xf32>,
    %c0_42 = arith.constant 0 : index
    %c0_43 = arith.constant 0 : index
    %20 = vector.load %arg6[%c0_42, %c0_43] : memref<1x8xf32, #tpu.memory_space<vmem>>, vector<1x8xf32>
    %c0_44 = arith.constant 0 : index
    %c0_45 = arith.constant 0 : index
    %c0_46 = arith.constant 0 : index
    %21 = vector.load %arg8[%c0_44, %c0_45, %c0_46] : memref<17x24x16xf32, #tpu.memory_space<vmem>>, vector<16x24x16xf32>
    %22 = vector.shape_cast %21 : vector<16x24x16xf32> to vector<384x16xf32>
    %c0_47 = arith.constant 0 : index
    %c0_48 = arith.constant 0 : index
    %c0_49 = arith.constant 0 : index
    %23 = vector.load %arg5[%c0_47, %c0_48, %c0_49] : memref<2x16x8xf32, #tpu.memory_space<vmem>>, vector<1x16x8xf32>
    %24 = vector.shape_cast %23 : vector<1x16x8xf32> to vector<16x8xf32>
    %cst = arith.constant dense<0.000000e+00> : vector<384x8xf32>
    %25 = tpu.matmul %22, %24, %cst {dimension_numbers = #tpu.dot_dimension_numbers<[1], [0], [0], [1], [0, 0, 1, 1], [], []>} : vector<384x16xf32>, vector<16x8xf32>, vector<384x8xf32> -> vector<384x8xf32>
    %26 = vector.broadcast %20 : vector<1x8xf32> to vector<384x8xf32>
    %27 = arith.addf %25, %26 : vector<384x8xf32>
    %28 = vector.shape_cast %27 : vector<384x8xf32> to vector<16x24x8xf32>
    %29 = vector.extract_strided_slice %28 {offsets = [0, 0, 0], sizes = [16, 16, 4], strides = [1, 1, 1]} : vector<16x24x8xf32> to vector<16x16x4xf32>
    %c0_50 = arith.constant 0 : index
    %c0_51 = arith.constant 0 : index
    %c0_52 = arith.constant 0 : index
    %c0_53 = arith.constant 0 : index
    %c0_54 = arith.constant 0 : index
    %30 = vector.load %arg7[%c0_50, %c0_51, %c0_52, %c0_53, %c0_54] : memref<1x16x2x16x8xf32, #tpu.memory_space<vmem>>, vector<1x16x1x16x4xf32>
    %31 = vector.shape_cast %30 : vector<1x16x1x16x4xf32> to vector<16x16x4xf32>
    %32 = vector.shape_cast %29 : vector<16x16x4xf32> to vector<1x16x1x16x4xf32>
    tpu.vector_store %arg7[%c0_50, %c0_51, %c0_52, %c0_53, %c0_54], %32 {strides = array<i32>} : memref<1x16x2x16x8xf32, #tpu.memory_space<vmem>>, vector<1x16x1x16x4xf32>,
    %33 = vector.extract_strided_slice %28 {offsets = [0, 1, 4], sizes = [16, 16, 4], strides = [1, 1, 1]} : vector<16x24x8xf32> to vector<16x16x4xf32>
    %c0_55 = arith.constant 0 : index
    %c0_56 = arith.constant 0 : index
    %c0_57 = arith.constant 0 : index
    %c0_58 = arith.constant 0 : index
    %c4_59 = arith.constant 4 : index
    %34 = vector.load %arg7[%c0_55, %c0_56, %c0_57, %c0_58, %c4_59] : memref<1x16x2x16x8xf32, #tpu.memory_space<vmem>>, vector<1x16x1x16x4xf32>
    %35 = vector.shape_cast %34 : vector<1x16x1x16x4xf32> to vector<16x16x4xf32>
    %36 = vector.shape_cast %33 : vector<16x16x4xf32> to vector<1x16x1x16x4xf32>
    tpu.vector_store %arg7[%c0_55, %c0_56, %c0_57, %c0_58, %c4_59], %36 {strides = array<i32>} : memref<1x16x2x16x8xf32, #tpu.memory_space<vmem>>, vector<1x16x1x16x4xf32>,
    %c1_60 = arith.constant 1 : index
    %c0_61 = arith.constant 0 : index
    %c0_62 = arith.constant 0 : index
    %37 = vector.load %arg8[%c1_60, %c0_61, %c0_62] : memref<17x24x16xf32, #tpu.memory_space<vmem>>, vector<16x24x16xf32>
    %38 = vector.shape_cast %37 : vector<16x24x16xf32> to vector<384x16xf32>
    %c1_63 = arith.constant 1 : index
    %c0_64 = arith.constant 0 : index
    %c0_65 = arith.constant 0 : index
    %39 = vector.load %arg5[%c1_63, %c0_64, %c0_65] : memref<2x16x8xf32, #tpu.memory_space<vmem>>, vector<1x16x8xf32>
    %40 = vector.shape_cast %39 : vector<1x16x8xf32> to vector<16x8xf32>
    %cst_66 = arith.constant dense<0.000000e+00> : vector<384x8xf32>
    %41 = tpu.matmul %38, %40, %cst_66 {dimension_numbers = #tpu.dot_dimension_numbers<[1], [0], [0], [1], [0, 0, 1, 1], [], []>} : vector<384x16xf32>, vector<16x8xf32>, vector<384x8xf32> -> vector<384x8xf32>
    %42 = vector.broadcast %20 : vector<1x8xf32> to vector<384x8xf32>
    %43 = arith.addf %41, %42 : vector<384x8xf32>
    %44 = vector.shape_cast %43 : vector<384x8xf32> to vector<16x24x8xf32>
    %45 = vector.extract_strided_slice %44 {offsets = [0, 0, 0], sizes = [16, 16, 4], strides = [1, 1, 1]} : vector<16x24x8xf32> to vector<16x16x4xf32>
    %c0_67 = arith.constant 0 : index
    %c0_68 = arith.constant 0 : index
    %c1_69 = arith.constant 1 : index
    %c0_70 = arith.constant 0 : index
    %c0_71 = arith.constant 0 : index
    %46 = vector.load %arg7[%c0_67, %c0_68, %c1_69, %c0_70, %c0_71] : memref<1x16x2x16x8xf32, #tpu.memory_space<vmem>>, vector<1x16x1x16x4xf32>
    %47 = vector.shape_cast %46 : vector<1x16x1x16x4xf32> to vector<16x16x4xf32>
    %48 = vector.shape_cast %45 : vector<16x16x4xf32> to vector<1x16x1x16x4xf32>
    tpu.vector_store %arg7[%c0_67, %c0_68, %c1_69, %c0_70, %c0_71], %48 {strides = array<i32>} : memref<1x16x2x16x8xf32, #tpu.memory_space<vmem>>, vector<1x16x1x16x4xf32>,
    %49 = vector.extract_strided_slice %44 {offsets = [0, 1, 4], sizes = [16, 16, 4], strides = [1, 1, 1]} : vector<16x24x8xf32> to vector<16x16x4xf32>
    %c0_72 = arith.constant 0 : index
    %c0_73 = arith.constant 0 : index
    %c1_74 = arith.constant 1 : index
    %c0_75 = arith.constant 0 : index
    %c4_76 = arith.constant 4 : index
    %50 = vector.load %arg7[%c0_72, %c0_73, %c1_74, %c0_75, %c4_76] : memref<1x16x2x16x8xf32, #tpu.memory_space<vmem>>, vector<1x16x1x16x4xf32>
    %51 = vector.shape_cast %50 : vector<1x16x1x16x4xf32> to vector<16x16x4xf32>
    %52 = vector.shape_cast %49 : vector<16x16x4xf32> to vector<1x16x1x16x4xf32>
    tpu.vector_store %arg7[%c0_72, %c0_73, %c1_74, %c0_75, %c4_76], %52 {strides = array<i32>} : memref<1x16x2x16x8xf32, #tpu.memory_space<vmem>>, vector<1x16x1x16x4xf32>,
    return
  }
  func.func @transform_0(%arg0: i32, %arg1: i32) -> (i32, i32, i32, i32) {
    %c0_i32 = arith.constant 0 : i32
    %c0_i32_0 = arith.constant 0 : i32
    %c0_i32_1 = arith.constant 0 : i32
    return %arg0, %arg1, %c0_i32, %c0_i32_0 : i32, i32, i32, i32
  }
  func.func @transform_1(%arg0: i32, %arg1: i32) -> (i32, i32, i32, i32) {
    %c0_i32 = arith.constant 0 : i32
    %c0_i32_0 = arith.constant 0 : i32
    %c0_i32_1 = arith.constant 0 : i32
    return %arg0, %arg1, %c0_i32, %c0_i32_0 : i32, i32, i32, i32
  }
  func.func @transform_2(%arg0: i32, %arg1: i32) -> (i32, i32, i32, i32) {
    %c0_i32 = arith.constant 0 : i32
    %c0_i32_0 = arith.constant 0 : i32
    %c0_i32_1 = arith.constant 0 : i32
    return %arg0, %arg1, %c0_i32, %c0_i32_0 : i32, i32, i32, i32
  }
  func.func @transform_3(%arg0: i32, %arg1: i32) -> (i32, i32, i32) {
    %c0_i32 = arith.constant 0 : i32
    %c0_i32_0 = arith.constant 0 : i32
    %c0_i32_1 = arith.constant 0 : i32
    %c0_i32_2 = arith.constant 0 : i32
    return %c0_i32, %c0_i32_0, %c0_i32_1 : i32, i32, i32
  }
  func.func @transform_4(%arg0: i32, %arg1: i32) -> (i32, i32) {
    %c0_i32 = arith.constant 0 : i32
    %c0_i32_0 = arith.constant 0 : i32
    %c0_i32_1 = arith.constant 0 : i32
    return %c0_i32, %c0_i32_0 : i32, i32
  }
  func.func @transform_5(%arg0: i32, %arg1: i32) -> (i32, i32, i32, i32, i32) {
    %c0_i32 = arith.constant 0 : i32
    %c0_i32_0 = arith.constant 0 : i32
    %c0_i32_1 = arith.constant 0 : i32
    %c0_i32_2 = arith.constant 0 : i32
    return %arg0, %arg1, %c0_i32, %c0_i32_0, %c0_i32_1 : i32, i32, i32, i32, i32
  }
}

</mosaic_0001>

<bundles_post_ra>
// kernel: tpu_custom_call.1
= control target key start
LH: loop header
LB: loop body
LE: loop exit
PB: predicated region body
PF: predicated region fallthrough
CT: control target
= control target key end

     0   :  { %s3060_s18 = smov 0   ;;  %s3062_s19 = smov 0   ;;  %s4286_s0 = inlined_call_operand.vmem [shape: f32[2,16,18,4], index: 0, kind: input, shape index: {}]   ;;  %s4287_s1 = inlined_call_operand.vmem [shape: f32[2,1,18,4], index: 1, kind: input, shape index: {}]   ;;  %s4288_s2 = inlined_call_operand.vmem [shape: f32[2,1,18,4], index: 2, kind: input, shape index: {}]   ;;  %s4289_s3 = inlined_call_operand.vmem [shape: f32[2,16,8], index: 3, kind: input, shape index: {}]   ;;  %s4290_s4 = inlined_call_operand.vmem [shape: f32[1,8], index: 4, kind: input, shape index: {}]   ;;  %s4291_s5 = inlined_call_operand.vmem [shape: f32[2,16,2,16,8], index: 5, kind: output, shape index: {}]  }
   0x1   :  { %s3064_s20 = smov 0  }
   0x2 LB: > { %s27_s21 = sadd.s32 1, %s3021_s19  ;;  %p2534_p0 = scmp.ge.s32.totalorder %s3025_s20, 1  ;;  %s3025_s20 = sphi %s3064_s20, %s15_s20   ;;  %s3021_s19 = sphi %s3062_s19, %s4293_s19   ;;  %s3017_s18 = sphi %s3060_s18, %s4292_s18  }
   0x3   : > { %p29_p1 = scmp.ge.s32.totalorder %s27_s21, 2  ;;  %p241_p2 = scmp.lt.s32.totalorder %s3025_s20, 3 }
   0x5   : > { %s4295_s21 = smov (%p29_p1, %s27_s21), 0  ;;  %p242_p3 = pnand %p2534_p0, %p241_p2 }
   0x6   : > { %p298_p4 = scmp.lt.s32.totalorder (!%p242_p3), %s3017_s18, 1  ;;  %s3027_s27 = smov (!%p242_p3), 8  }
   0x7   : > { %245 = sbr.rel (%p242_p3) target bundleno = 645 (0x285), region = 40  ;;  %s3028_s6 = smov (!%p242_p3), 4  }
   0x8   : > { %s3029_s7 = smov (!%p242_p3), 12  }
   0xc   : > { %s4297_s18 = smov (!%p298_p4, %s3017_s18), 1  ;;  %vm391_vm0 = vcmask 31744   ;;  %vm394_vm1 = vcmask 24576   ;;  %v1273_v33 = vld [vmem:[%s4289_s3 + $0x8] sm:$0xff]  ;;  %v2590_v34 = vld [vmem:[%s4289_s3 + $0x18] sm:$0xff]  ;;  %v1272_v36 = vld [vmem:[%s4289_s3] sm:$0xff] }
   0xd   : > { %s2974_s22 = smul.u32 384, %s4297_s18  ;;  %2822 = vmatprep.subr.mxu0 %v1273_v33  ;;  %2898 = vmatprep.subr.mxu1 %v2590_v34  ;;  %v2589_v37 = vld [vmem:[%s4289_s3 + $0x10] sm:$0xff]  ;;  %vm637_vm2 = vcmask 97344   ;;  %vm769_vm3 = vcmask 64544   ;;  %vm1158_vm4 = vcmask 130144   ;;  %vm640_vm5 = vcmask 90176  }
   0xe   : > { %s2975_s26 = smul.u32 24, %s4297_s18  ;;  %2823 = vmatpush3.msra.mxu0 %v1273_v33  ;;  %2899 = vmatpush3.msra.mxu1 %v2590_v34  ;;  %vm1280_vm6 = vcmask 130048   ;;  %vm772_vm7 = vcmask 57376   ;;  %vm1161_vm8 = vcmask 122976   ;;  %s2721_s23 = sshll.u32 %s4297_s18, 9  ;;  %vm1762_vm9 = vcmask 64545  }
   0xf   : > { %s3084_s25 = scalar_lea.vmem %s4286_s0, %s2974_s22  ;;  %2824 = vmatprep.subr.mxu0 %v1272_v36  ;;  %2900 = vmatprep.subr.mxu1 %v2589_v37  ;;  %s3787_s28 = scalar_lea.vmem %s4291_s5, %s2721_s23 }
  0x10   : > { %v338_v0 = vld [vmem:[%s3084_s25 + $0x8] sm:$0xff]  ;;  %v337_v1 = vld [vmem:[%s3084_s25] sm:$0xff]  ;;  %v340_v3 = vld [vmem:[%s3084_s25 + $0x18] sm:$0xff]  ;;  %s3102_s30 = scalar_lea.vmem %s4287_s1, %s2975_s26  ;;  %2825 = vmatpush3.msra.mxu0 %v1272_v36  ;;  %2901 = vmatpush3.msra.mxu1 %v2589_v37  ;;  %s3707_s22 = scalar_lea.vmem %s4288_s2, %s2975_s26 }
  0x11   : > { %v341_v2 = vld [vmem:[%s3084_s25 + $0x20] sm:$0xff]  ;;  %495 = vrot.lane.b32.xlu1 %v338_v0, %s3027_s27  ;;  %398 = vst.msk [vmem:[#allocation2 + $0x20] sm:$0xff] %vm391_vm0, %v338_v0  ;;  %493 = vrot.lane.b32.xlu0 %v337_v1, %s3027_s27  ;;  %397 = vst.msk [vmem:[#allocation2 + $0x18] sm:$0xff] %vm391_vm0, %v337_v1  ;;  %v3105_v4 = vld [vmem:[%s3084_s25 + $0x28] sm:$0x1] }
  0x12   : > { %401 = vst.msk [vmem:[#allocation2 + $0x38] sm:$0xff] %vm391_vm0, %v341_v2  ;;  %400 = vst.msk [vmem:[#allocation2 + $0x30] sm:$0xff] %vm391_vm0, %v340_v3  ;;  %v3110_v5 = vld [vmem:[%s3084_s25 + $0x10] sm:$0x1]  ;;  %v703_v7 = vld [vmem:[%s3084_s25 + $0x1] sm:$0xff] }
  0x13   : > { %402 = vst.msk [vmem:[#allocation2 + $0x40] sm:$0x1] %vm394_vm1, %v3105_v4  ;;  %v3113_v6 = vld [vmem:[%s3084_s25 + $0x30] sm:$0xff]  ;;  %399 = vst.msk [vmem:[#allocation2 + $0x28] sm:$0x1] %vm394_vm1, %v3110_v5  ;;  %v751_v8 = vld [vmem:[%s3102_s30 + $0x1] sm:$0xff] }
  0x14   : > { %403 = vst.msk [vmem:[#allocation2 + $0x48] sm:$0xff] %vm391_vm0, %v3113_v6  ;;  %v3124_v9 = vld [vmem:[%s3084_s25 + $0x38] sm:$0xff]  ;;  %v3127_v10 = vld [vmem:[%s3084_s25 + $0x40] sm:$0x1]  ;;  %v3134_v11 = vld [vmem:[%s3084_s25 + $0x48] sm:$0xff] }
  0x15   : > { %501 = vrot.lane.b32.xlu1 %v341_v2, %s3027_s27  ;;  %499 = vrot.lane.b32.xlu0 %v340_v3, %s3027_s27  ;;  %404 = vst.msk [vmem:[#allocation2 + $0x50] sm:$0xff] %vm391_vm0, %v3124_v9  ;;  %406 = vst.msk [vmem:[#allocation2 + $0x60] sm:$0xff] %vm391_vm0, %v3134_v11  ;;  %v3139_v12 = vld [vmem:[%s3084_s25 + $0x50] sm:$0xff]  ;;  %v3142_v13 = vld [vmem:[%s3084_s25 + $0x58] sm:$0x1] }
  0x16   : > { %405 = vst.msk [vmem:[#allocation2 + $0x58] sm:$0x1] %vm394_vm1, %v3127_v10  ;;  %408 = vst.msk [vmem:[#allocation2 + $0x70] sm:$0x1] %vm394_vm1, %v3142_v13  ;;  %v3151_v14 = vld [vmem:[%s3084_s25 + $0x60] sm:$0xff]  ;;  %v704_v15 = vld [vmem:[%s3084_s25 + $0x9] sm:$0xff] }
  0x17   : > { %407 = vst.msk [vmem:[#allocation2 + $0x68] sm:$0xff] %vm391_vm0, %v3139_v12  ;;  %v752_v16 = vld [vmem:[%s3102_s30 + $0x9] sm:$0xff]  ;;  %409 = vst.msk [vmem:[#allocation2 + $0x78] sm:$0xff] %vm391_vm0, %v3151_v14  ;;  %v3166_v19 = vld [vmem:[%s3084_s25 + $0x78] sm:$0xff] }
  0x18   : > { %v3158_v17 = vld [vmem:[%s3084_s25 + $0x68] sm:$0xff]  ;;  %v3163_v18 = vld [vmem:[%s3084_s25 + $0x70] sm:$0x1]  ;;  %412 = vst.msk [vmem:[#allocation2 + $0x90] sm:$0xff] %vm391_vm0, %v3166_v19  ;;  %v3173_v20 = vld [vmem:[%s3084_s25 + $0x80] sm:$0xff] }
  0x19   : > { %822 = vrot.lane.b32.xlu1 %v703_v7, %s3028_s6  ;;  %760 = vrot.lane.b32.xlu0 %v751_v8, %s3028_s6  ;;  %410 = vst.msk [vmem:[#allocation2 + $0x80] sm:$0xff] %vm391_vm0, %v3158_v17  ;;  %413 = vst.msk [vmem:[#allocation2 + $0x98] sm:$0xff] %vm391_vm0, %v3173_v20  ;;  %v3180_v21 = vld [vmem:[%s3084_s25 + $0x88] sm:$0x1]  ;;  %v706_v22 = vld [vmem:[%s3084_s25 + $0x19] sm:$0xff] }
  0x1a   : > { %411 = vst.msk [vmem:[#allocation2 + $0x88] sm:$0x1] %vm394_vm1, %v3163_v18  ;;  %414 = vst.msk [vmem:[#allocation2 + $0xa0] sm:$0x1] %vm394_vm1, %v3180_v21  ;;  %v3186_v23 = vld [vmem:[%s3084_s25 + $0x90] sm:$0xff]  ;;  %v3189_v24 = vld [vmem:[%s3084_s25 + $0x98] sm:$0xff] }
  0x1b   : > { %415 = vst.msk [vmem:[#allocation2 + $0xa8] sm:$0xff] %vm391_vm0, %v3186_v23  ;;  %416 = vst.msk [vmem:[#allocation2 + $0xb0] sm:$0xff] %vm391_vm0, %v3189_v24  ;;  %v386_v25 = vld [vmem:[%s3102_s30 + $0x8] sm:$0xff]  ;;  %v385_v26 = vld [vmem:[%s3102_s30] sm:$0xff] }
  0x1c   : > { %393 = vst.msk [vmem:[#allocation2 + $0x8] sm:$0xff] %vm391_vm0, %v386_v25  ;;  %392 = vst.msk [vmem:[#allocation2] sm:$0xff] %vm391_vm0, %v385_v26  ;;  %v3200_v27 = vld [vmem:[%s3084_s25 + $0xa0] sm:$0x1]  ;;  %v3203_v28 = vld [vmem:[%s3084_s25 + $0xa8] sm:$0xff] }
  0x1d   : > { %824 = vrot.lane.b32.xlu1 %v704_v15, %s3028_s6  ;;  %762 = vrot.lane.b32.xlu0 %v752_v16, %s3028_s6  ;;  %417 = vst.msk [vmem:[#allocation2 + $0xb8] sm:$0x1] %vm394_vm1, %v3200_v27  ;;  %v3212_v29 = vld [vmem:[%s3084_s25 + $0xb0] sm:$0xff]  ;;  %v707_v30 = vld [vmem:[%s3084_s25 + $0x21] sm:$0xff] }
  0x1e   : > { %418 = vst.msk [vmem:[#allocation2 + $0xc0] sm:$0xff] %vm391_vm0, %v3203_v28  ;;  %419 = vst.msk [vmem:[#allocation2 + $0xc8] sm:$0xff] %vm391_vm0, %v3212_v29  ;;  %v3218_v31 = vld [vmem:[%s3084_s25 + $0xb8] sm:$0x1]  ;;  %v387_v32 = vld [vmem:[%s3102_s30 + $0x10] sm:$0x1] }
  0x1f   : > { %420 = vst.msk [vmem:[#allocation2 + $0xd0] sm:$0x1] %vm394_vm1, %v3218_v31  ;;  %395 = vst.msk [vmem:[#allocation2 + $0x10] sm:$0x1] %vm394_vm1, %v387_v32  ;;  %v3231_v35 = vld [vmem:[%s3084_s25 + $0xc0] sm:$0xff]  ;;  %v3244_v38 = vld [vmem:[%s3084_s25 + $0xc8] sm:$0xff] }
  0x20   : > { %421 = vst.msk [vmem:[#allocation2 + $0xd8] sm:$0xff] %vm391_vm0, %v3231_v35  ;;  %422 = vst.msk [vmem:[#allocation2 + $0xe0] sm:$0xff] %vm391_vm0, %v3244_v38  ;;  %v3249_v39 = vld [vmem:[%s3084_s25 + $0xd0] sm:$0x1]  ;;  %v753_v40 = vld [vmem:[%s3102_s30 + $0x11] sm:$0x1] }
  0x21   : > { %1020 = vrot.lane.b32.xlu1 %v706_v22, %s3029_s7  ;;  %1014 = vrot.lane.b32.xlu0 %v703_v7, %s3029_s7  ;;  %423 = vst.msk [vmem:[#allocation2 + $0xe8] sm:$0x1] %vm394_vm1, %v3249_v39  ;;  %v705_v41 = vld [vmem:[%s3084_s25 + $0x11] sm:$0x1]  ;;  %v3263_v42 = vld [vmem:[%s3084_s25 + $0xd8] sm:$0xff] }
  0x22   : > { %424 = vst.msk [vmem:[#allocation2 + $0xf0] sm:$0xff] %vm391_vm0, %v3263_v42  ;;  %v708_v43 = vld [vmem:[%s3084_s25 + $0x29] sm:$0x1]  ;;  %v3273_v44 = vld [vmem:[%s3084_s25 + $0xe0] sm:$0xff]  ;;  %v709_v45 = vld [vmem:[%s3084_s25 + $0x31] sm:$0xff] }
  0x23   : > { %425 = vst.msk [vmem:[#allocation2 + $0xf8] sm:$0xff] %vm391_vm0, %v3273_v44  ;;  %v3282_v46 = vld [vmem:[%s3084_s25 + $0xe8] sm:$0x1]  ;;  %v710_v47 = vld [vmem:[%s3084_s25 + $0x39] sm:$0xff]  ;;  %v3293_v48 = vld [vmem:[%s3084_s25 + $0xf0] sm:$0xff] }
  0x24   : > { %426 = vst.msk [vmem:[#allocation2 + $0x100] sm:$0x1] %vm394_vm1, %v3282_v46  ;;  %v711_v49 = vld [vmem:[%s3084_s25 + $0x41] sm:$0x1]  ;;  %v3302_v50 = vld [vmem:[%s3084_s25 + $0xf8] sm:$0xff]  ;;  %v712_v51 = vld [vmem:[%s3084_s25 + $0x49] sm:$0xff] }
  0x25   : > { %1022 = vrot.lane.b32.xlu1 %v707_v30, %s3029_s7  ;;  %1016 = vrot.lane.b32.xlu0 %v704_v15, %s3029_s7  ;;  %427 = vst.msk [vmem:[#allocation2 + $0x108] sm:$0xff] %vm391_vm0, %v3293_v48  ;;  %428 = vst.msk [vmem:[#allocation2 + $0x110] sm:$0xff] %vm391_vm0, %v3302_v50  ;;  %v3313_v52 = vld [vmem:[%s3084_s25 + $0x100] sm:$0x1]  ;;  %v713_v53 = vld [vmem:[%s3084_s25 + $0x51] sm:$0xff] }
  0x26   : > { %429 = vst.msk [vmem:[#allocation2 + $0x118] sm:$0x1] %vm394_vm1, %v3313_v52  ;;  %v3322_v54 = vld [vmem:[%s3084_s25 + $0x108] sm:$0xff]  ;;  %v714_v55 = vld [vmem:[%s3084_s25 + $0x59] sm:$0x1]  ;;  %v3333_v56 = vld [vmem:[%s3084_s25 + $0x110] sm:$0xff] }
  0x27   : > { %430 = vst.msk [vmem:[#allocation2 + $0x120] sm:$0xff] %vm391_vm0, %v3322_v54  ;;  %v715_v57 = vld [vmem:[%s3084_s25 + $0x61] sm:$0xff]  ;;  %431 = vst.msk [vmem:[#allocation2 + $0x128] sm:$0xff] %vm391_vm0, %v3333_v56  ;;  %v3342_v58 = vld [vmem:[%s3084_s25 + $0x118] sm:$0x1] }
  0x28   : > { %432 = vst.msk [vmem:[#allocation2 + $0x130] sm:$0x1] %vm394_vm1, %v3342_v58  ;;  %v716_v59 = vld [vmem:[%s3084_s25 + $0x69] sm:$0xff]  ;;  %v3353_v60 = vld [vmem:[%s3084_s25 + $0x120] sm:$0xff]  ;;  %v717_v61 = vld [vmem:[%s3084_s25 + $0x71] sm:$0x1] }
  0x29   : > { %503 = vrot.lane.b32.xlu1 %v3105_v4, %s3027_s27  ;;  %497 = vrot.lane.b32.xlu0 %v3110_v5, %s3027_s27  ;;  %433 = vst.msk [vmem:[#allocation2 + $0x138] sm:$0xff] %vm391_vm0, %v3353_v60  ;;  %v3362_v62 = vld [vmem:[%s3084_s25 + $0x128] sm:$0xff]  ;;  %v718_v63 = vld [vmem:[%s3084_s25 + $0x79] sm:$0xff] }
  0x2a   : > { %434 = vst.msk [vmem:[#allocation2 + $0x140] sm:$0xff] %vm391_vm0, %v3362_v62  ;;  %v3373_v0 = vld [vmem:[%s3084_s25 + $0x130] sm:$0x1]  ;;  %v719_v1 = vld [vmem:[%s3084_s25 + $0x81] sm:$0xff]  ;;  %v3382_v2 = vld [vmem:[%s3084_s25 + $0x138] sm:$0xff] }
  0x2b   : > { %435 = vst.msk [vmem:[#allocation2 + $0x148] sm:$0x1] %vm394_vm1, %v3373_v0  ;;  %v720_v3 = vld [vmem:[%s3084_s25 + $0x89] sm:$0x1]  ;;  %v3393_v4 = vld [vmem:[%s3084_s25 + $0x140] sm:$0xff]  ;;  %v721_v5 = vld [vmem:[%s3084_s25 + $0x91] sm:$0xff] }
  0x2c   : > { %436 = vst.msk [vmem:[#allocation2 + $0x150] sm:$0xff] %vm391_vm0, %v3382_v2  ;;  %437 = vst.msk [vmem:[#allocation2 + $0x158] sm:$0xff] %vm391_vm0, %v3393_v4  ;;  %v3404_v8 = vld [vmem:[%s3084_s25 + $0x148] sm:$0x1] }
  0x2d   : > { %764 = vrot.lane.b32.xlu1 %v753_v40, %s3028_s6  ;;  %505 = vrot.lane.b32.xlu0 %v3113_v6, %s3027_s27  ;;  %438 = vst.msk [vmem:[#allocation2 + $0x160] sm:$0x1] %vm394_vm1, %v3404_v8  ;;  %v727_v37 = vld [vmem:[%s3084_s25 + $0xc1] sm:$0xff] }
  0x31   : > { %828 = vrot.lane.b32.xlu1 %v706_v22, %s3028_s6  ;;  %826 = vrot.lane.b32.xlu0 %v705_v41, %s3028_s6  ;;  %v3443_v22 = vld [vmem:[%s3084_s25 + $0x160] sm:$0x1] }
  0x32   : > { %441 = vst.msk [vmem:[#allocation2 + $0x178] sm:$0x1] %vm394_vm1, %v3443_v22 }
  0x35   : > { %1024 = vrot.lane.b32.xlu1 %v708_v43, %s3029_s7  ;;  %1018 = vrot.lane.b32.xlu0 %v705_v41, %s3029_s7 }
  0x39   : > { %507 = vrot.lane.b32.xlu1 %v3124_v9, %s3027_s27  ;;  %1026 = vrot.lane.b32.xlu0 %v709_v45, %s3029_s7  ;;  %v722_v9 = vld [vmem:[%s3084_s25 + $0x99] sm:$0xff] }
  0x3d   : > { %830 = vrot.lane.b32.xlu1 %v707_v30, %s3028_s6  ;;  %509 = vrot.lane.b32.xlu0 %v3127_v10, %s3027_s27  ;;  %v3458_v30 = vld [vmem:[%s3084_s25 + $0x168] sm:$0xff] }
  0x3e   : > { %442 = vst.msk [vmem:[#allocation2 + $0x180] sm:$0xff] %vm391_vm0, %v3458_v30 }
  0x41   : > { %1028 = vrot.lane.b32.xlu1 %v710_v47, %s3029_s7  ;;  %832 = vrot.lane.b32.xlu0 %v708_v43, %s3028_s6 }
  0x45   : > { %511 = vrot.lane.b32.xlu1 %v3134_v11, %s3027_s27  ;;  %1030 = vrot.lane.b32.xlu0 %v711_v49, %s3029_s7 }
  0x49   : > { %834 = vrot.lane.b32.xlu1 %v709_v45, %s3028_s6  ;;  %513 = vrot.lane.b32.xlu0 %v3139_v12, %s3027_s27  ;;  %v3417_v12 = vld [vmem:[%s3084_s25 + $0x150] sm:$0xff] }
  0x4a   : > { %439 = vst.msk [vmem:[#allocation2 + $0x168] sm:$0xff] %vm391_vm0, %v3417_v12 }
  0x4d   : > { %1032 = vrot.lane.b32.xlu1 %v712_v51, %s3029_s7  ;;  %836 = vrot.lane.b32.xlu0 %v710_v47, %s3028_s6  ;;  %v3486_v47 = vld [vmem:[%s3084_s25 + $0x178] sm:$0x1] }
  0x4e   : > { %444 = vst.msk [vmem:[#allocation2 + $0x190] sm:$0x1] %vm394_vm1, %v3486_v47 }
  0x51   : > { %515 = vrot.lane.b32.xlu1 %v3142_v13, %s3027_s27  ;;  %1034 = vrot.lane.b32.xlu0 %v713_v53, %s3029_s7  ;;  %v723_v13 = vld [vmem:[%s3084_s25 + $0xa1] sm:$0x1] }
  0x55   : > { %838 = vrot.lane.b32.xlu1 %v711_v49, %s3028_s6  ;;  %517 = vrot.lane.b32.xlu0 %v3151_v14, %s3027_s27 }
  0x59   : > { %1036 = vrot.lane.b32.xlu1 %v714_v55, %s3029_s7  ;;  %840 = vrot.lane.b32.xlu0 %v712_v51, %s3028_s6 }
  0x5d   : > { %519 = vrot.lane.b32.xlu1 %v3158_v17, %s3027_s27  ;;  %1038 = vrot.lane.b32.xlu0 %v715_v57, %s3029_s7 }
  0x61   : > { %842 = vrot.lane.b32.xlu1 %v713_v53, %s3028_s6  ;;  %521 = vrot.lane.b32.xlu0 %v3163_v18, %s3027_s27  ;;  %v3430_v18 = vld [vmem:[%s3084_s25 + $0x158] sm:$0xff]  ;;  %v729_v53 = vld [vmem:[%s3084_s25 + $0xd1] sm:$0x1] }
  0x62   : > { %440 = vst.msk [vmem:[#allocation2 + $0x170] sm:$0xff] %vm391_vm0, %v3430_v18 }
  0x65   : > { %1040 = vrot.lane.b32.xlu1 %v716_v59, %s3029_s7  ;;  %844 = vrot.lane.b32.xlu0 %v714_v55, %s3028_s6 }
  0x69   : > { %523 = vrot.lane.b32.xlu1 %v3166_v19, %s3027_s27  ;;  %1042 = vrot.lane.b32.xlu0 %v717_v61, %s3029_s7  ;;  %v724_v19 = vld [vmem:[%s3084_s25 + $0xa9] sm:$0xff] }
  0x6d   : > { %846 = vrot.lane.b32.xlu1 %v715_v57, %s3028_s6  ;;  %525 = vrot.lane.b32.xlu0 %v3173_v20, %s3027_s27 }
  0x71   : > { %1044 = vrot.lane.b32.xlu1 %v718_v63, %s3029_s7  ;;  %848 = vrot.lane.b32.xlu0 %v716_v59, %s3028_s6 }
  0x75   : > { %527 = vrot.lane.b32.xlu1 %v3180_v21, %s3027_s27  ;;  %1046 = vrot.lane.b32.xlu0 %v719_v1, %s3029_s7 }
  0x79   : > { %850 = vrot.lane.b32.xlu1 %v717_v61, %s3028_s6  ;;  %529 = vrot.lane.b32.xlu0 %v3186_v23, %s3027_s27  ;;  %v725_v23 = vld [vmem:[%s3084_s25 + $0xb1] sm:$0xff] }
  0x7d   : > { %1048 = vrot.lane.b32.xlu1 %v720_v3, %s3029_s7  ;;  %852 = vrot.lane.b32.xlu0 %v718_v63, %s3028_s6 }
  0x81   : > { %531 = vrot.lane.b32.xlu1 %v3189_v24, %s3027_s27  ;;  %1050 = vrot.lane.b32.xlu0 %v721_v5, %s3029_s7 }
  0x83   : > { %v496_v6 = vpop.permute.xlu1 %495  ;;  %v494_v7 = vpop.permute.xlu0 %493 }
  0x84   : > { %639 = vst.msk [vmem:[#allocation2 + $0x8] sm:$0xff] %vm637_vm2, %v496_v6  ;;  %638 = vst.msk [vmem:[#allocation2] sm:$0xff] %vm637_vm2, %v494_v7  ;;  %v731_v6 = vld [vmem:[%s3084_s25 + $0xe1] sm:$0xff] }
  0x85   : > { %854 = vrot.lane.b32.xlu1 %v719_v1, %s3028_s6  ;;  %533 = vrot.lane.b32.xlu0 %v3200_v27, %s3027_s27 }
  0x87   : > { %v502_v10 = vpop.permute.xlu1 %501  ;;  %v500_v11 = vpop.permute.xlu0 %499 }
  0x88   : > { %643 = vst.msk [vmem:[#allocation2 + $0x20] sm:$0xff] %vm637_vm2, %v502_v10  ;;  %642 = vst.msk [vmem:[#allocation2 + $0x18] sm:$0xff] %vm637_vm2, %v500_v11 }
  0x89   : > { %1052 = vrot.lane.b32.xlu1 %v722_v9, %s3029_s7  ;;  %856 = vrot.lane.b32.xlu0 %v720_v3, %s3028_s6 }
  0x8b   : > { %v823_v14 = vpop.permute.xlu1 %822  ;;  %v761_v15 = vpop.permute.xlu0 %760 }
  0x8c   : > { %966 = vst.msk [vmem:[#allocation2 + $0x18] sm:$0xff] %vm769_vm3, %v823_v14  ;;  %770 = vst.msk [vmem:[#allocation2] sm:$0xff] %vm769_vm3, %v761_v15 }
  0x8d   : > { %535 = vrot.lane.b32.xlu1 %v3203_v28, %s3027_s27  ;;  %1054 = vrot.lane.b32.xlu0 %v723_v13, %s3029_s7 }
  0x8f   : > { %v825_v16 = vpop.permute.xlu1 %824  ;;  %v763_v17 = vpop.permute.xlu0 %762 }
  0x90   : > { %967 = vst.msk [vmem:[#allocation2 + $0x20] sm:$0xff] %vm769_vm3, %v825_v16  ;;  %771 = vst.msk [vmem:[#allocation2 + $0x8] sm:$0xff] %vm769_vm3, %v763_v17  ;;  %v733_v16 = vld [vmem:[%s3084_s25 + $0xf1] sm:$0xff] }
  0x91   : > { %858 = vrot.lane.b32.xlu1 %v721_v5, %s3028_s6  ;;  %537 = vrot.lane.b32.xlu0 %v3212_v29, %s3027_s27 }
  0x93   : > { %v1021_v20 = vpop.permute.xlu1 %1020  ;;  %v1015_v21 = vpop.permute.xlu0 %1014 }
  0x94   : > { %1163 = vst.msk [vmem:[#allocation2 + $0x18] sm:$0xff] %vm1158_vm4, %v1021_v20  ;;  %1159 = vst.msk [vmem:[#allocation2] sm:$0xff] %vm1158_vm4, %v1015_v21 }
  0x95   : > { %1056 = vrot.lane.b32.xlu1 %v724_v19, %s3029_s7  ;;  %860 = vrot.lane.b32.xlu0 %v722_v9, %s3028_s6 }
  0x97   : > { %v1023_v24 = vpop.permute.xlu1 %1022  ;;  %v1017_v25 = vpop.permute.xlu0 %1016 }
  0x98   : > { %1164 = vst.msk [vmem:[#allocation2 + $0x20] sm:$0xff] %vm1158_vm4, %v1023_v24  ;;  %1160 = vst.msk [vmem:[#allocation2 + $0x8] sm:$0xff] %vm1158_vm4, %v1017_v25 }
  0x99   : > { %539 = vrot.lane.b32.xlu1 %v3218_v31, %s3027_s27  ;;  %1058 = vrot.lane.b32.xlu0 %v725_v23, %s3029_s7  ;;  %v726_v31 = vld [vmem:[%s3084_s25 + $0xb9] sm:$0x1] }
  0x9b   : > { %v504_v26 = vpop.permute.xlu1 %503  ;;  %v498_v27 = vpop.permute.xlu0 %497  ;;  %v1224_v28 = vld [vmem:[#allocation2] sm:$0xff]  ;;  %v1811_v29 = vld [vmem:[#allocation2 + $0x18] sm:$0xff] }
  0x9c   : > { %644 = vst.msk [vmem:[#allocation2 + $0x28] sm:$0x1] %vm640_vm5, %v504_v26  ;;  %641 = vst.msk [vmem:[#allocation2 + $0x10] sm:$0x1] %vm640_vm5, %v498_v27  ;;  %2826 = vmatprep.mubr.msk.f32.mxu0 %vm1280_vm6, %v1224_v28  ;;  %2902 = vmatprep.mubr.msk.f32.mxu1 %vm1280_vm6, %v1811_v29  ;;  %v735_v26 = vld [vmem:[%s3084_s25 + $0x101] sm:$0x1] }
  0x9d   : > { %862 = vrot.lane.b32.xlu1 %v723_v13, %s3028_s6  ;;  %541 = vrot.lane.b32.xlu0 %v3231_v35, %s3027_s27  ;;  %v3473_v35 = vld [vmem:[%s3084_s25 + $0x170] sm:$0xff] }
  0x9e   : > { %443 = vst.msk [vmem:[#allocation2 + $0x188] sm:$0xff] %vm391_vm0, %v3473_v35 }
  0x9f   : > { %v765_v32 = vpop.permute.xlu1 %764  ;;  %v506_v33 = vpop.permute.xlu0 %505  ;;  %v1225_v34 = vld [vmem:[#allocation2 + $0x8] sm:$0xff]  ;;  %v1812_v36 = vld [vmem:[#allocation2 + $0x20] sm:$0xff] }
  0xa0   : > { %773 = vst.msk [vmem:[#allocation2 + $0x10] sm:$0x1] %vm772_vm7, %v765_v32  ;;  %2827 = vmatmul.mubr.msk.f32.vlgmr.msra.gmra.mxu0 %vm1280_vm6, %v1225_v34  ;;  %2903 = vmatmul.mubr.msk.f32.vlgmr.msra.gmra.mxu1 %vm1280_vm6, %v1812_v36 }
  0xa1   : > { %645 = vst.msk [vmem:[#allocation2 + $0x30] sm:$0xff] %vm637_vm2, %v506_v33  ;;  %1060 = vrot.lane.b32.xlu1 %v726_v31, %s3029_s7  ;;  %864 = vrot.lane.b32.xlu0 %v724_v19, %s3028_s6 }
  0xa3   : > { %v829_v40 = vpop.permute.xlu1 %828  ;;  %v827_v41 = vpop.permute.xlu0 %826 }
  0xa4   : > { %969 = vst.msk [vmem:[#allocation2 + $0x30] sm:$0xff] %vm769_vm3, %v829_v40 }
  0xa5   : > { %968 = vst.msk [vmem:[#allocation2 + $0x28] sm:$0x1] %vm772_vm7, %v827_v41  ;;  %543 = vrot.lane.b32.xlu1 %v3244_v38, %s3027_s27  ;;  %1062 = vrot.lane.b32.xlu0 %v727_v37, %s3029_s7  ;;  %v728_v38 = vld [vmem:[%s3084_s25 + $0xc9] sm:$0xff] }
  0xa7   : > { %v1025_v43 = vpop.permute.xlu1 %1024  ;;  %v1019_v45 = vpop.permute.xlu0 %1018 }
  0xa8   : > { %1165 = vst.msk [vmem:[#allocation2 + $0x28] sm:$0x1] %vm1161_vm8, %v1025_v43  ;;  %1162 = vst.msk [vmem:[#allocation2 + $0x10] sm:$0x1] %vm1161_vm8, %v1019_v45 }
  0xa9   : > { %866 = vrot.lane.b32.xlu1 %v725_v23, %s3028_s6  ;;  %545 = vrot.lane.b32.xlu0 %v3249_v39, %s3027_s27 }
  0xab   : > { %v508_v49 = vpop.permute.xlu1 %507  ;;  %v1027_v51 = vpop.permute.xlu0 %1026 }
  0xac   : > { %646 = vst.msk [vmem:[#allocation2 + $0x38] sm:$0xff] %vm637_vm2, %v508_v49 }
  0xad   : > { %1166 = vst.msk [vmem:[#allocation2 + $0x30] sm:$0xff] %vm1158_vm4, %v1027_v51  ;;  %1064 = vrot.lane.b32.xlu1 %v728_v38, %s3029_s7  ;;  %868 = vrot.lane.b32.xlu0 %v726_v31, %s3028_s6  ;;  %v739_v51 = vld [vmem:[%s3084_s25 + $0x121] sm:$0xff] }
  0xaf   : > { %v831_v55 = vpop.permute.xlu1 %830  ;;  %v510_v57 = vpop.permute.xlu0 %509  ;;  %v1226_v59 = vld [vmem:[#allocation2 + $0x10] sm:$0xff]  ;;  %v1813_v61 = vld [vmem:[#allocation2 + $0x28] sm:$0xff] }
  0xb0   : > { %970 = vst.msk [vmem:[#allocation2 + $0x38] sm:$0xff] %vm769_vm3, %v831_v55  ;;  %2829 = vmatprep.mubr.msk.f32.mxu0 %vm1280_vm6, %v1226_v59  ;;  %2905 = vmatprep.mubr.msk.f32.mxu1 %vm1280_vm6, %v1813_v61 }
  0xb1   : > { %647 = vst.msk [vmem:[#allocation2 + $0x40] sm:$0x1] %vm640_vm5, %v510_v57  ;;  %547 = vrot.lane.b32.xlu1 %v3263_v42, %s3027_s27  ;;  %1066 = vrot.lane.b32.xlu0 %v729_v53, %s3029_s7  ;;  %v730_v42 = vld [vmem:[%s3084_s25 + $0xd9] sm:$0xff] }
  0xb2   : > { %2830 = vmatmul.mubr.msk.f32.gmra.mxu0 %vm1280_vm6, %v1811_v29 }
  0xb3   : > { %2832 = vmatprep.mubr.msk.f32.mxu0 %vm1280_vm6, %v1812_v36  ;;  %v1029_v39 = vpop.permute.xlu1 %1028  ;;  %v833_v63 = vpop.permute.xlu0 %832  ;;  %v737_v36 = vld [vmem:[%s3084_s25 + $0x111] sm:$0xff] }
  0xb4   : > { %v1814_v1 = vld [vmem:[#allocation2 + $0x30] sm:$0xff]  ;;  %1167 = vst.msk [vmem:[#allocation2 + $0x38] sm:$0xff] %vm1158_vm4, %v1029_v39 }
  0xb5   : > { %971 = vst.msk [vmem:[#allocation2 + $0x40] sm:$0x1] %vm772_vm7, %v833_v63  ;;  %2906 = vmatmul.mubr.msk.f32.gmra.mxu1 %vm1280_vm6, %v1814_v1  ;;  %870 = vrot.lane.b32.xlu1 %v727_v37, %s3028_s6 }
  0xb6   : > { %549 = vrot.lane.b32.xlu0 %v3273_v44, %s3027_s27  ;;  %2833 = vmatmul.mubr.msk.f32.gmra.mxu0 %vm1280_vm6, %v1813_v61 }
  0xb7   : > { %2835 = vmatprep.mubr.msk.f32.mxu0 %vm1280_vm6, %v1814_v1  ;;  %v512_v3 = vpop.permute.xlu1 %511  ;;  %v1031_v5 = vpop.permute.xlu0 %1030  ;;  %v741_v1 = vld [vmem:[%s3084_s25 + $0x131] sm:$0x1] }
  0xb8   : > { %648 = vst.msk [vmem:[#allocation2 + $0x48] sm:$0xff] %vm637_vm2, %v512_v3 }
  0xb9   : > { %1168 = vst.msk [vmem:[#allocation2 + $0x40] sm:$0x1] %vm1161_vm8, %v1031_v5  ;;  %1068 = vrot.lane.b32.xlu1 %v730_v42, %s3029_s7 }
  0xba   : > { %872 = vrot.lane.b32.xlu0 %v728_v38, %s3028_s6 }
  0xbb   : > { %v835_v7 = vpop.permute.xlu1 %834  ;;  %v514_v9 = vpop.permute.xlu0 %513  ;;  %v1231_v10 = vld [vmem:[#allocation2 + $0x38] sm:$0xff] }
  0xbc   : > { %972 = vst.msk [vmem:[#allocation2 + $0x48] sm:$0xff] %vm769_vm3, %v835_v7  ;;  %2836 = vmatmul.mubr.msk.f32.gmra.mxu0 %vm1280_vm6, %v1231_v10  ;;  %2908 = vmatprep.mubr.msk.f32.mxu1 %vm1280_vm6, %v1231_v10 }
  0xbd   : > { %649 = vst.msk [vmem:[#allocation2 + $0x50] sm:$0xff] %vm637_vm2, %v514_v9  ;;  %551 = vrot.lane.b32.xlu1 %v3282_v46, %s3027_s27  ;;  %v732_v46 = vld [vmem:[%s3084_s25 + $0xe9] sm:$0x1] }
  0xbe   : > { %1070 = vrot.lane.b32.xlu0 %v731_v6, %s3029_s7 }
  0xbf   : > { %v1033_v44 = vpop.permute.xlu1 %1032  ;;  %v837_v11 = vpop.permute.xlu0 %836 }
  0xc0   : > { %v1232_v13 = vld [vmem:[#allocation2 + $0x40] sm:$0xff]  ;;  %1169 = vst.msk [vmem:[#allocation2 + $0x48] sm:$0xff] %vm1158_vm4, %v1033_v44 }
  0xc1   : > { %973 = vst.msk [vmem:[#allocation2 + $0x50] sm:$0xff] %vm769_vm3, %v837_v11  ;;  %2838 = vmatprep.mubr.msk.f32.mxu0 %vm1280_vm6, %v1232_v13  ;;  %2909 = vmatmul.mubr.msk.f32.gmra.mxu1 %vm1280_vm6, %v1232_v13  ;;  %v743_v44 = vld [vmem:[%s3084_s25 + $0x141] sm:$0xff] }
  0xc2   : > { %874 = vrot.lane.b32.xlu1 %v729_v53, %s3028_s6  ;;  %553 = vrot.lane.b32.xlu0 %v3293_v48, %s3027_s27 }
  0xc3   : > { %v516_v14 = vpop.permute.xlu1 %515  ;;  %v1035_v15 = vpop.permute.xlu0 %1034 }
  0xc4   : > { %650 = vst.msk [vmem:[#allocation2 + $0x58] sm:$0x1] %vm640_vm5, %v516_v14 }
  0xc5   : > { %1170 = vst.msk [vmem:[#allocation2 + $0x50] sm:$0xff] %vm1158_vm4, %v1035_v15 }
  0xc6   : > { %1072 = vrot.lane.b32.xlu1 %v732_v46, %s3029_s7  ;;  %876 = vrot.lane.b32.xlu0 %v730_v42, %s3028_s6 }
  0xc7   : > { %v839_v17 = vpop.permute.xlu1 %838  ;;  %v518_v19 = vpop.permute.xlu0 %517  ;;  %v1233_v20 = vld [vmem:[#allocation2 + $0x48] sm:$0xff] }
  0xc8   : > { %974 = vst.msk [vmem:[#allocation2 + $0x58] sm:$0x1] %vm772_vm7, %v839_v17  ;;  %2839 = vmatmul.mubr.msk.f32.gmra.mxu0 %vm1280_vm6, %v1233_v20  ;;  %2911 = vmatprep.mubr.msk.f32.mxu1 %vm1280_vm6, %v1233_v20 }
  0xc9   : > { %651 = vst.msk [vmem:[#allocation2 + $0x60] sm:$0xff] %vm637_vm2, %v518_v19  ;;  %v745_v19 = vld [vmem:[%s3084_s25 + $0x151] sm:$0xff] }
  0xca   : > { %555 = vrot.lane.b32.xlu1 %v3302_v50, %s3027_s27  ;;  %1074 = vrot.lane.b32.xlu0 %v733_v16, %s3029_s7  ;;  %v734_v50 = vld [vmem:[%s3084_s25 + $0xf9] sm:$0xff] }
  0xcb   : > { %v1037_v48 = vpop.permute.xlu1 %1036  ;;  %v841_v21 = vpop.permute.xlu0 %840 }
  0xcc   : > { %v1234_v23 = vld [vmem:[#allocation2 + $0x50] sm:$0xff]  ;;  %1171 = vst.msk [vmem:[#allocation2 + $0x58] sm:$0x1] %vm1161_vm8, %v1037_v48 }
  0xcd   : > { %975 = vst.msk [vmem:[#allocation2 + $0x60] sm:$0xff] %vm769_vm3, %v841_v21  ;;  %2841 = vmatprep.mubr.msk.f32.mxu0 %vm1280_vm6, %v1234_v23  ;;  %2912 = vmatmul.mubr.msk.f32.gmra.mxu1 %vm1280_vm6, %v1234_v23 }
  0xce   : > { %878 = vrot.lane.b32.xlu1 %v731_v6, %s3028_s6  ;;  %557 = vrot.lane.b32.xlu0 %v3313_v52, %s3027_s27 }
  0xcf   : > { %v520_v24 = vpop.permute.xlu1 %519  ;;  %v1039_v25 = vpop.permute.xlu0 %1038 }
  0xd0   : > { %652 = vst.msk [vmem:[#allocation2 + $0x68] sm:$0xff] %vm637_vm2, %v520_v24 }
  0xd1   : > { %1172 = vst.msk [vmem:[#allocation2 + $0x60] sm:$0xff] %vm1158_vm4, %v1039_v25 }
  0xd2   : > { %1076 = vrot.lane.b32.xlu1 %v734_v50, %s3029_s7  ;;  %880 = vrot.lane.b32.xlu0 %v732_v46, %s3028_s6 }
  0xd3   : > { %v843_v27 = vpop.permute.xlu1 %842  ;;  %v522_v28 = vpop.permute.xlu0 %521  ;;  %v1235_v29 = vld [vmem:[#allocation2 + $0x58] sm:$0xff] }
  0xd4   : > { %976 = vst.msk [vmem:[#allocation2 + $0x68] sm:$0xff] %vm769_vm3, %v843_v27  ;;  %2842 = vmatmul.mubr.msk.f32.gmra.mxu0 %vm1280_vm6, %v1235_v29  ;;  %2914 = vmatprep.mubr.msk.f32.mxu1 %vm1280_vm6, %v1235_v29 }
  0xd5   : > { %653 = vst.msk [vmem:[#allocation2 + $0x70] sm:$0x1] %vm640_vm5, %v522_v28 }
  0xd6   : > { %559 = vrot.lane.b32.xlu1 %v3322_v54, %s3027_s27  ;;  %1078 = vrot.lane.b32.xlu0 %v735_v26, %s3029_s7  ;;  %v736_v54 = vld [vmem:[%s3084_s25 + $0x109] sm:$0xff] }
  0xd7   : > { %v1041_v52 = vpop.permute.xlu1 %1040  ;;  %v845_v31 = vpop.permute.xlu0 %844 }
  0xd8   : > { %v1236_v32 = vld [vmem:[#allocation2 + $0x60] sm:$0xff]  ;;  %1173 = vst.msk [vmem:[#allocation2 + $0x68] sm:$0xff] %vm1158_vm4, %v1041_v52 }
  0xd9   : > { %977 = vst.msk [vmem:[#allocation2 + $0x70] sm:$0x1] %vm772_vm7, %v845_v31  ;;  %2844 = vmatprep.mubr.msk.f32.mxu0 %vm1280_vm6, %v1236_v32  ;;  %2915 = vmatmul.mubr.msk.f32.gmra.mxu1 %vm1280_vm6, %v1236_v32 }
  0xda   : > { %882 = vrot.lane.b32.xlu1 %v733_v16, %s3028_s6  ;;  %561 = vrot.lane.b32.xlu0 %v3333_v56, %s3027_s27 }
  0xdb   : > { %v524_v33 = vpop.permute.xlu1 %523  ;;  %v1043_v34 = vpop.permute.xlu0 %1042 }
  0xdc   : > { %654 = vst.msk [vmem:[#allocation2 + $0x78] sm:$0xff] %vm637_vm2, %v524_v33  ;;  %v749_v33 = vld [vmem:[%s3084_s25 + $0x171] sm:$0xff] }
  0xdd   : > { %1174 = vst.msk [vmem:[#allocation2 + $0x70] sm:$0x1] %vm1161_vm8, %v1043_v34 }
  0xde   : > { %1080 = vrot.lane.b32.xlu1 %v736_v54, %s3029_s7  ;;  %884 = vrot.lane.b32.xlu0 %v734_v50, %s3028_s6 }
  0xdf   : > { %v847_v37 = vpop.permute.xlu1 %846  ;;  %v526_v40 = vpop.permute.xlu0 %525  ;;  %v1237_v41 = vld [vmem:[#allocation2 + $0x68] sm:$0xff] }
  0xe0   : > { %978 = vst.msk [vmem:[#allocation2 + $0x78] sm:$0xff] %vm769_vm3, %v847_v37  ;;  %2845 = vmatmul.mubr.msk.f32.gmra.mxu0 %vm1280_vm6, %v1237_v41  ;;  %2917 = vmatprep.mubr.msk.f32.mxu1 %vm1280_vm6, %v1237_v41 }
  0xe1   : > { %655 = vst.msk [vmem:[#allocation2 + $0x80] sm:$0xff] %vm637_vm2, %v526_v40 }
  0xe2   : > { %563 = vrot.lane.b32.xlu1 %v3342_v58, %s3027_s27  ;;  %1082 = vrot.lane.b32.xlu0 %v737_v36, %s3029_s7  ;;  %v738_v58 = vld [vmem:[%s3084_s25 + $0x119] sm:$0x1] }
  0xe3   : > { %v1045_v56 = vpop.permute.xlu1 %1044  ;;  %v849_v43 = vpop.permute.xlu0 %848 }
  0xe4   : > { %v1238_v45 = vld [vmem:[#allocation2 + $0x70] sm:$0xff]  ;;  %1175 = vst.msk [vmem:[#allocation2 + $0x78] sm:$0xff] %vm1158_vm4, %v1045_v56 }
  0xe5   : > { %979 = vst.msk [vmem:[#allocation2 + $0x80] sm:$0xff] %vm769_vm3, %v849_v43  ;;  %2847 = vmatprep.mubr.msk.f32.mxu0 %vm1280_vm6, %v1238_v45  ;;  %2918 = vmatmul.mubr.msk.f32.gmra.mxu1 %vm1280_vm6, %v1238_v45 }
  0xe6   : > { %886 = vrot.lane.b32.xlu1 %v735_v26, %s3028_s6  ;;  %565 = vrot.lane.b32.xlu0 %v3353_v60, %s3027_s27  ;;  %v747_v26 = vld [vmem:[%s3084_s25 + $0x161] sm:$0x1] }
  0xe7   : > { %v528_v38 = vpop.permute.xlu1 %527  ;;  %v1047_v49 = vpop.permute.xlu0 %1046 }
  0xe8   : > { %656 = vst.msk [vmem:[#allocation2 + $0x88] sm:$0x1] %vm640_vm5, %v528_v38  ;;  %v389_v38 = vld [vmem:[%s3707_s22 + $0x8] sm:$0xff] }
  0xe9   : > { %1176 = vst.msk [vmem:[#allocation2 + $0x80] sm:$0xff] %vm1158_vm4, %v1047_v49 }
  0xea   : > { %1084 = vrot.lane.b32.xlu1 %v738_v58, %s3029_s7  ;;  %888 = vrot.lane.b32.xlu0 %v736_v54, %s3028_s6 }
  0xeb   : > { %v851_v53 = vpop.permute.xlu1 %850  ;;  %v530_v55 = vpop.permute.xlu0 %529  ;;  %v1239_v57 = vld [vmem:[#allocation2 + $0x78] sm:$0xff] }
  0xec   : > { %980 = vst.msk [vmem:[#allocation2 + $0x88] sm:$0x1] %vm772_vm7, %v851_v53  ;;  %2848 = vmatmul.mubr.msk.f32.gmra.mxu0 %vm1280_vm6, %v1239_v57  ;;  %2920 = vmatprep.mubr.msk.f32.mxu1 %vm1280_vm6, %v1239_v57 }
  0xed   : > { %657 = vst.msk [vmem:[#allocation2 + $0x90] sm:$0xff] %vm637_vm2, %v530_v55  ;;  %v390_v55 = vld [vmem:[%s3707_s22 + $0x10] sm:$0x1] }
  0xee   : > { %567 = vrot.lane.b32.xlu1 %v3362_v62, %s3027_s27  ;;  %1086 = vrot.lane.b32.xlu0 %v739_v51, %s3029_s7  ;;  %v740_v62 = vld [vmem:[%s3084_s25 + $0x129] sm:$0xff] }
  0xef   : > { %v1049_v60 = vpop.permute.xlu1 %1048  ;;  %v853_v59 = vpop.permute.xlu0 %852 }
  0xf0   : > { %v1240_v61 = vld [vmem:[#allocation2 + $0x80] sm:$0xff]  ;;  %1177 = vst.msk [vmem:[#allocation2 + $0x88] sm:$0x1] %vm1161_vm8, %v1049_v60 }
  0xf1   : > { %981 = vst.msk [vmem:[#allocation2 + $0x90] sm:$0xff] %vm769_vm3, %v853_v59  ;;  %2850 = vmatprep.mubr.msk.f32.mxu0 %vm1280_vm6, %v1240_v61  ;;  %2921 = vmatmul.mubr.msk.f32.gmra.mxu1 %vm1280_vm6, %v1240_v61  ;;  %v755_v61 = vld [vmem:[%s3707_s22 + $0x9] sm:$0xff] }
  0xf2   : > { %890 = vrot.lane.b32.xlu1 %v737_v36, %s3028_s6  ;;  %569 = vrot.lane.b32.xlu0 %v3373_v0, %s3027_s27 }
  0xf3   : > { %v532_v39 = vpop.permute.xlu1 %531  ;;  %v1051_v63 = vpop.permute.xlu0 %1050 }
  0xf4   : > { %658 = vst.msk [vmem:[#allocation2 + $0x98] sm:$0xff] %vm637_vm2, %v532_v39 }
  0xf5   : > { %1178 = vst.msk [vmem:[#allocation2 + $0x90] sm:$0xff] %vm1158_vm4, %v1051_v63  ;;  %v756_v63 = vld [vmem:[%s3707_s22 + $0x11] sm:$0x1] }
  0xf6   : > { %1088 = vrot.lane.b32.xlu1 %v740_v62, %s3029_s7  ;;  %892 = vrot.lane.b32.xlu0 %v738_v58, %s3028_s6  ;;  %v754_v58 = vld [vmem:[%s3707_s22 + $0x1] sm:$0xff] }
  0xf7   : > { %v855_v42 = vpop.permute.xlu1 %854  ;;  %v534_v3 = vpop.permute.xlu0 %533  ;;  %v1241_v5 = vld [vmem:[#allocation2 + $0x88] sm:$0xff] }
  0xf8   : > { %982 = vst.msk [vmem:[#allocation2 + $0x98] sm:$0xff] %vm769_vm3, %v855_v42  ;;  %2851 = vmatmul.mubr.msk.f32.gmra.mxu0 %vm1280_vm6, %v1241_v5  ;;  %2923 = vmatprep.mubr.msk.f32.mxu1 %vm1280_vm6, %v1241_v5 }
  0xf9   : > { %659 = vst.msk [vmem:[#allocation2 + $0xa0] sm:$0x1] %vm640_vm5, %v534_v3 }
  0xfa   : > { %571 = vrot.lane.b32.xlu1 %v3382_v2, %s3027_s27  ;;  %1090 = vrot.lane.b32.xlu0 %v741_v1, %s3029_s7  ;;  %v742_v2 = vld [vmem:[%s3084_s25 + $0x139] sm:$0xff] }
  0xfb   : > { %v1053_v0 = vpop.permute.xlu1 %1052  ;;  %v857_v6 = vpop.permute.xlu0 %856 }
  0xfc   : > { %v1242_v7 = vld [vmem:[#allocation2 + $0x90] sm:$0xff]  ;;  %1179 = vst.msk [vmem:[#allocation2 + $0x98] sm:$0xff] %vm1158_vm4, %v1053_v0 }
  0xfd   : > { %983 = vst.msk [vmem:[#allocation2 + $0xa0] sm:$0x1] %vm772_vm7, %v857_v6  ;;  %2853 = vmatprep.mubr.msk.f32.mxu0 %vm1280_vm6, %v1242_v7  ;;  %2924 = vmatmul.mubr.msk.f32.gmra.mxu1 %vm1280_vm6, %v1242_v7 }
  0xfe   : > { %894 = vrot.lane.b32.xlu1 %v739_v51, %s3028_s6  ;;  %573 = vrot.lane.b32.xlu0 %v3393_v4, %s3027_s27 }
  0xff   : > { %v536_v9 = vpop.permute.xlu1 %535  ;;  %v1055_v10 = vpop.permute.xlu0 %1054 }
 0x100   : > { %660 = vst.msk [vmem:[#allocation2 + $0xa8] sm:$0xff] %vm637_vm2, %v536_v9 }
 0x101   : > { %1180 = vst.msk [vmem:[#allocation2 + $0xa0] sm:$0x1] %vm1161_vm8, %v1055_v10 }
 0x102   : > { %1092 = vrot.lane.b32.xlu1 %v742_v2, %s3029_s7  ;;  %896 = vrot.lane.b32.xlu0 %v740_v62, %s3028_s6 }
 0x103   : > { %v859_v11 = vpop.permute.xlu1 %858  ;;  %v538_v13 = vpop.permute.xlu0 %537  ;;  %v1243_v46 = vld [vmem:[#allocation2 + $0x98] sm:$0xff] }
 0x104   : > { %984 = vst.msk [vmem:[#allocation2 + $0xa8] sm:$0xff] %vm769_vm3, %v859_v11  ;;  %2854 = vmatmul.mubr.msk.f32.gmra.mxu0 %vm1280_vm6, %v1243_v46  ;;  %2926 = vmatprep.mubr.msk.f32.mxu1 %vm1280_vm6, %v1243_v46 }
 0x105   : > { %661 = vst.msk [vmem:[#allocation2 + $0xb0] sm:$0xff] %vm637_vm2, %v538_v13 }
 0x106   : > { %575 = vrot.lane.b32.xlu1 %v3404_v8, %s3027_s27  ;;  %1094 = vrot.lane.b32.xlu0 %v743_v44, %s3029_s7  ;;  %v744_v8 = vld [vmem:[%s3084_s25 + $0x149] sm:$0x1] }
 0x107   : > { %v1057_v4 = vpop.permute.xlu1 %1056  ;;  %v861_v14 = vpop.permute.xlu0 %860 }
 0x108   : > { %v1244_v15 = vld [vmem:[#allocation2 + $0xa0] sm:$0xff]  ;;  %1181 = vst.msk [vmem:[#allocation2 + $0xa8] sm:$0xff] %vm1158_vm4, %v1057_v4 }
 0x109   : > { %985 = vst.msk [vmem:[#allocation2 + $0xb0] sm:$0xff] %vm769_vm3, %v861_v14  ;;  %2856 = vmatprep.mubr.msk.f32.mxu0 %vm1280_vm6, %v1244_v15  ;;  %2927 = vmatmul.mubr.msk.f32.gmra.mxu1 %vm1280_vm6, %v1244_v15 }
 0x10a   : > { %898 = vrot.lane.b32.xlu1 %v741_v1, %s3028_s6  ;;  %577 = vrot.lane.b32.xlu0 %v3417_v12, %s3027_s27 }
 0x10b   : > { %v540_v16 = vpop.permute.xlu1 %539  ;;  %v1059_v17 = vpop.permute.xlu0 %1058 }
 0x10c   : > { %662 = vst.msk [vmem:[#allocation2 + $0xb8] sm:$0x1] %vm640_vm5, %v540_v16 }
 0x10d   : > { %1182 = vst.msk [vmem:[#allocation2 + $0xb0] sm:$0xff] %vm1158_vm4, %v1059_v17 }
 0x10e   : > { %1096 = vrot.lane.b32.xlu1 %v744_v8, %s3029_s7  ;;  %900 = vrot.lane.b32.xlu0 %v742_v2, %s3028_s6 }
 0x10f   : > { %v863_v20 = vpop.permute.xlu1 %862  ;;  %v542_v48 = vpop.permute.xlu0 %541  ;;  %v1245_v21 = vld [vmem:[#allocation2 + $0xa8] sm:$0xff] }
 0x110   : > { %986 = vst.msk [vmem:[#allocation2 + $0xb8] sm:$0x1] %vm772_vm7, %v863_v20  ;;  %2857 = vmatmul.mubr.msk.f32.gmra.mxu0 %vm1280_vm6, %v1245_v21  ;;  %2929 = vmatprep.mubr.msk.f32.mxu1 %vm1280_vm6, %v1245_v21 }
 0x111   : > { %663 = vst.msk [vmem:[#allocation2 + $0xc0] sm:$0xff] %vm637_vm2, %v542_v48  ;;  %v3782_v48 = vld [vmem:[%s4290_s4] ss:$0 sm:$0xff] }
 0x112   : > { %579 = vrot.lane.b32.xlu1 %v3430_v18, %s3027_s27  ;;  %1098 = vrot.lane.b32.xlu0 %v745_v19, %s3029_s7  ;;  %v746_v18 = vld [vmem:[%s3084_s25 + $0x159] sm:$0xff] }
 0x113   : > { %v1061_v12 = vpop.permute.xlu1 %1060  ;;  %v865_v23 = vpop.permute.xlu0 %864 }
 0x114   : > { %v1246_v50 = vld [vmem:[#allocation2 + $0xb0] sm:$0xff]  ;;  %1183 = vst.msk [vmem:[#allocation2 + $0xb8] sm:$0x1] %vm1161_vm8, %v1061_v12 }
 0x115   : > { %987 = vst.msk [vmem:[#allocation2 + $0xc0] sm:$0xff] %vm769_vm3, %v865_v23  ;;  %2859 = vmatprep.mubr.msk.f32.mxu0 %vm1280_vm6, %v1246_v50  ;;  %2930 = vmatmul.mubr.msk.f32.gmra.mxu1 %vm1280_vm6, %v1246_v50 }
 0x116   : > { %902 = vrot.lane.b32.xlu1 %v743_v44, %s3028_s6  ;;  %581 = vrot.lane.b32.xlu0 %v3443_v22, %s3027_s27 }
 0x117   : > { %v544_v24 = vpop.permute.xlu1 %543  ;;  %v1063_v25 = vpop.permute.xlu0 %1062 }
 0x118   : > { %664 = vst.msk [vmem:[#allocation2 + $0xc8] sm:$0xff] %vm637_vm2, %v544_v24 }
 0x119   : > { %1184 = vst.msk [vmem:[#allocation2 + $0xc0] sm:$0xff] %vm1158_vm4, %v1063_v25 }
 0x11a   : > { %1100 = vrot.lane.b32.xlu1 %v746_v18, %s3029_s7  ;;  %904 = vrot.lane.b32.xlu0 %v744_v8, %s3028_s6 }
 0x11b   : > { %v867_v27 = vpop.permute.xlu1 %866  ;;  %v546_v28 = vpop.permute.xlu0 %545  ;;  %v1247_v29 = vld [vmem:[#allocation2 + $0xb8] sm:$0xff] }
 0x11c   : > { %988 = vst.msk [vmem:[#allocation2 + $0xc8] sm:$0xff] %vm769_vm3, %v867_v27  ;;  %2860 = vmatmul.mubr.msk.f32.gmra.mxu0 %vm1280_vm6, %v1247_v29  ;;  %2932 = vmatprep.mubr.msk.f32.mxu1 %vm1280_vm6, %v1247_v29 }
 0x11d   : > { %665 = vst.msk [vmem:[#allocation2 + $0xd0] sm:$0x1] %vm640_vm5, %v546_v28 }
 0x11e   : > { %583 = vrot.lane.b32.xlu1 %v3458_v30, %s3027_s27  ;;  %1102 = vrot.lane.b32.xlu0 %v747_v26, %s3029_s7  ;;  %v748_v30 = vld [vmem:[%s3084_s25 + $0x169] sm:$0xff] }
 0x11f   : > { %v1065_v22 = vpop.permute.xlu1 %1064  ;;  %v869_v52 = vpop.permute.xlu0 %868 }
 0x120   : > { %v1248_v31 = vld [vmem:[#allocation2 + $0xc0] sm:$0xff]  ;;  %1185 = vst.msk [vmem:[#allocation2 + $0xc8] sm:$0xff] %vm1158_vm4, %v1065_v22 }
 0x121   : > { %989 = vst.msk [vmem:[#allocation2 + $0xd0] sm:$0x1] %vm772_vm7, %v869_v52  ;;  %2862 = vmatprep.mubr.msk.f32.mxu0 %vm1280_vm6, %v1248_v31  ;;  %2933 = vmatmul.mubr.msk.f32.gmra.mxu1 %vm1280_vm6, %v1248_v31 }
 0x122   : > { %906 = vrot.lane.b32.xlu1 %v745_v19, %s3028_s6  ;;  %585 = vrot.lane.b32.xlu0 %v3473_v35, %s3027_s27  ;;  %v388_v35 = vld [vmem:[%s3707_s22] sm:$0xff] }
 0x123   : > { %v548_v32 = vpop.permute.xlu1 %547  ;;  %v1067_v54 = vpop.permute.xlu0 %1066 }
 0x124   : > { %666 = vst.msk [vmem:[#allocation2 + $0xd8] sm:$0xff] %vm637_vm2, %v548_v32 }
 0x125   : > { %1186 = vst.msk [vmem:[#allocation2 + $0xd0] sm:$0x1] %vm1161_vm8, %v1067_v54 }
 0x126   : > { %1104 = vrot.lane.b32.xlu1 %v748_v30, %s3029_s7  ;;  %908 = vrot.lane.b32.xlu0 %v746_v18, %s3028_s6 }
 0x127   : > { %v871_v34 = vpop.permute.xlu1 %870  ;;  %v1249_v37 = vld [vmem:[#allocation2 + $0xc8] sm:$0xff] }
 0x128   : > { %v550_v36 = vpop.permute.xlu0 %549  ;;  %990 = vst.msk [vmem:[#allocation2 + $0xd8] sm:$0xff] %vm769_vm3, %v871_v34  ;;  %2863 = vmatmul.mubr.msk.f32.gmra.mxu0 %vm1280_vm6, %v1249_v37  ;;  %2935 = vmatprep.mubr.msk.f32.mxu1 %vm1280_vm6, %v1249_v37 }
 0x129   : > { %667 = vst.msk [vmem:[#allocation2 + $0xe0] sm:$0xff] %vm637_vm2, %v550_v36 }
 0x12a   : > { %587 = vrot.lane.b32.xlu1 %v3486_v47, %s3027_s27  ;;  %1106 = vrot.lane.b32.xlu0 %v749_v33, %s3029_s7  ;;  %v750_v47 = vld [vmem:[%s3084_s25 + $0x179] sm:$0x1] }
 0x12b   : > { %v1069_v40 = vpop.permute.xlu1 %1068 }
 0x12c   : > { %v873_v41 = vpop.permute.xlu0 %872  ;;  %v1250_v56 = vld [vmem:[#allocation2 + $0xd0] sm:$0xff]  ;;  %1187 = vst.msk [vmem:[#allocation2 + $0xd8] sm:$0xff] %vm1158_vm4, %v1069_v40 }
 0x12d   : > { %991 = vst.msk [vmem:[#allocation2 + $0xe0] sm:$0xff] %vm769_vm3, %v873_v41  ;;  %2865 = vmatprep.mubr.msk.f32.mxu0 %vm1280_vm6, %v1250_v56  ;;  %2936 = vmatmul.mubr.msk.f32.gmra.mxu1 %vm1280_vm6, %v1250_v56 }
 0x12e   : > { %910 = vrot.lane.b32.xlu1 %v747_v26, %s3028_s6  ;;  %690 = vrot.lane.b32.xlu0 %v388_v35, %s3027_s27 }
 0x12f   : > { %v552_v43 = vpop.permute.xlu1 %551 }
 0x130   : > { %v1071_v45 = vpop.permute.xlu0 %1070  ;;  %668 = vst.msk [vmem:[#allocation2 + $0xe8] sm:$0x1] %vm640_vm5, %v552_v43 }
 0x131   : > { %1188 = vst.msk [vmem:[#allocation2 + $0xe0] sm:$0xff] %vm1158_vm4, %v1071_v45 }
 0x132   : > { %1108 = vrot.lane.b32.xlu1 %v750_v47, %s3029_s7  ;;  %912 = vrot.lane.b32.xlu0 %v748_v30, %s3028_s6 }
 0x133   : > { %v1251_v53 = vld [vmem:[#allocation2 + $0xd8] sm:$0xff] }
 0x134   : > { %v875_v49 = vpop.permute.xlu1 %874  ;;  %v554_v51 = vpop.permute.xlu0 %553  ;;  %2866 = vmatmul.mubr.msk.f32.gmra.mxu0 %vm1280_vm6, %v1251_v53  ;;  %2938 = vmatprep.mubr.msk.f32.mxu1 %vm1280_vm6, %v1251_v53 }
 0x135   : > { %992 = vst.msk [vmem:[#allocation2 + $0xe8] sm:$0x1] %vm772_vm7, %v875_v49 }
 0x136   : > { %669 = vst.msk [vmem:[#allocation2 + $0xf0] sm:$0xff] %vm637_vm2, %v554_v51  ;;  %1211 = vrot.lane.b32.xlu0 %v754_v58, %s3029_s7  ;;  %692 = vrot.lane.b32.xlu1 %v389_v38, %s3027_s27 }
 0x138   : > { %v1073_v57 = vpop.permute.xlu1 %1072  ;;  %v877_v60 = vpop.permute.xlu0 %876  ;;  %v1252_v59 = vld [vmem:[#allocation2 + $0xe0] sm:$0xff] }
 0x139   : > { %1189 = vst.msk [vmem:[#allocation2 + $0xe8] sm:$0x1] %vm1161_vm8, %v1073_v57  ;;  %2868 = vmatprep.mubr.msk.f32.mxu0 %vm1280_vm6, %v1252_v59  ;;  %2939 = vmatmul.mubr.msk.f32.gmra.mxu1 %vm1280_vm6, %v1252_v59 }
 0x13a   : > { %993 = vst.msk [vmem:[#allocation2 + $0xf0] sm:$0xff] %vm769_vm3, %v877_v60  ;;  %694 = vrot.lane.b32.xlu0 %v390_v55, %s3027_s27  ;;  %914 = vrot.lane.b32.xlu1 %v749_v33, %s3028_s6 }
 0x13c   : > { %v556_v62 = vpop.permute.xlu1 %555  ;;  %v1075_v39 = vpop.permute.xlu0 %1074 }
 0x13d   : > { %670 = vst.msk [vmem:[#allocation2 + $0xf8] sm:$0xff] %vm637_vm2, %v556_v62 }
 0x13e   : > { %1190 = vst.msk [vmem:[#allocation2 + $0xf0] sm:$0xff] %vm1158_vm4, %v1075_v39  ;;  %916 = vrot.lane.b32.xlu0 %v750_v47, %s3028_s6  ;;  %1213 = vrot.lane.b32.xlu1 %v755_v61, %s3029_s7 }
 0x140   : > { %v879_v1 = vpop.permute.xlu1 %878  ;;  %v558_v42 = vpop.permute.xlu0 %557  ;;  %v1253_v3 = vld [vmem:[#allocation2 + $0xe8] sm:$0xff] }
 0x141   : > { %994 = vst.msk [vmem:[#allocation2 + $0xf8] sm:$0xff] %vm769_vm3, %v879_v1  ;;  %2869 = vmatmul.mubr.msk.f32.gmra.mxu0 %vm1280_vm6, %v1253_v3  ;;  %2941 = vmatprep.mubr.msk.f32.mxu1 %vm1280_vm6, %v1253_v3 }
 0x142   : > { %671 = vst.msk [vmem:[#allocation2 + $0x100] sm:$0x1] %vm640_vm5, %v558_v42  ;;  %1215 = vrot.lane.b32.xlu0 %v756_v63, %s3029_s7 }
 0x144   : > { %v1077_v5 = vpop.permute.xlu1 %1076  ;;  %v881_v0 = vpop.permute.xlu0 %880 }
 0x145   : > { %v1254_v6 = vld [vmem:[#allocation2 + $0xf0] sm:$0xff]  ;;  %1191 = vst.msk [vmem:[#allocation2 + $0xf8] sm:$0xff] %vm1158_vm4, %v1077_v5 }
 0x146   : > { %995 = vst.msk [vmem:[#allocation2 + $0x100] sm:$0x1] %vm772_vm7, %v881_v0  ;;  %2871 = vmatprep.mubr.msk.f32.mxu0 %vm1280_vm6, %v1254_v6  ;;  %2942 = vmatmul.mubr.msk.f32.gmra.mxu1 %vm1280_vm6, %v1254_v6 }
 0x148   : > { %v560_v7 = vpop.permute.xlu1 %559  ;;  %v1079_v2 = vpop.permute.xlu0 %1078 }
 0x149   : > { %672 = vst.msk [vmem:[#allocation2 + $0x108] sm:$0xff] %vm637_vm2, %v560_v7 }
 0x14a   : > { %1192 = vst.msk [vmem:[#allocation2 + $0x100] sm:$0x1] %vm1161_vm8, %v1079_v2 }
 0x14c   : > { %v883_v9 = vpop.permute.xlu1 %882  ;;  %v562_v10 = vpop.permute.xlu0 %561  ;;  %v1255_v44 = vld [vmem:[#allocation2 + $0xf8] sm:$0xff] }
 0x14d   : > { %996 = vst.msk [vmem:[#allocation2 + $0x108] sm:$0xff] %vm769_vm3, %v883_v9  ;;  %2872 = vmatmul.mubr.msk.f32.gmra.mxu0 %vm1280_vm6, %v1255_v44  ;;  %2944 = vmatprep.mubr.msk.f32.mxu1 %vm1280_vm6, %v1255_v44 }
 0x14e   : > { %673 = vst.msk [vmem:[#allocation2 + $0x110] sm:$0xff] %vm637_vm2, %v562_v10 }
 0x150   : > { %v1081_v11 = vpop.permute.xlu1 %1080  ;;  %v885_v13 = vpop.permute.xlu0 %884 }
 0x151   : > { %v1256_v46 = vld [vmem:[#allocation2 + $0x100] sm:$0xff]  ;;  %1193 = vst.msk [vmem:[#allocation2 + $0x108] sm:$0xff] %vm1158_vm4, %v1081_v11 }
 0x152   : > { %997 = vst.msk [vmem:[#allocation2 + $0x110] sm:$0xff] %vm769_vm3, %v885_v13  ;;  %2874 = vmatprep.mubr.msk.f32.mxu0 %vm1280_vm6, %v1256_v46  ;;  %2945 = vmatmul.mubr.msk.f32.gmra.mxu1 %vm1280_vm6, %v1256_v46 }
 0x154   : > { %v564_v4 = vpop.permute.xlu1 %563  ;;  %v1083_v14 = vpop.permute.xlu0 %1082 }
 0x155   : > { %674 = vst.msk [vmem:[#allocation2 + $0x118] sm:$0x1] %vm640_vm5, %v564_v4 }
 0x156   : > { %1194 = vst.msk [vmem:[#allocation2 + $0x110] sm:$0xff] %vm1158_vm4, %v1083_v14 }
 0x158   : > { %v887_v15 = vpop.permute.xlu1 %886  ;;  %v566_v8 = vpop.permute.xlu0 %565  ;;  %v1257_v16 = vld [vmem:[#allocation2 + $0x108] sm:$0xff] }
 0x159   : > { %998 = vst.msk [vmem:[#allocation2 + $0x118] sm:$0x1] %vm772_vm7, %v887_v15  ;;  %2875 = vmatmul.mubr.msk.f32.gmra.mxu0 %vm1280_vm6, %v1257_v16  ;;  %2947 = vmatprep.mubr.msk.f32.mxu1 %vm1280_vm6, %v1257_v16 }
 0x15a   : > { %675 = vst.msk [vmem:[#allocation2 + $0x120] sm:$0xff] %vm637_vm2, %v566_v8 }
 0x15c   : > { %v1085_v17 = vpop.permute.xlu1 %1084  ;;  %v889_v19 = vpop.permute.xlu0 %888 }
 0x15d   : > { %v1258_v20 = vld [vmem:[#allocation2 + $0x110] sm:$0xff]  ;;  %1195 = vst.msk [vmem:[#allocation2 + $0x118] sm:$0x1] %vm1161_vm8, %v1085_v17 }
 0x15e   : > { %999 = vst.msk [vmem:[#allocation2 + $0x120] sm:$0xff] %vm769_vm3, %v889_v19  ;;  %2877 = vmatprep.mubr.msk.f32.mxu0 %vm1280_vm6, %v1258_v20  ;;  %2948 = vmatmul.mubr.msk.f32.gmra.mxu1 %vm1280_vm6, %v1258_v20 }
 0x160   : > { %v568_v21 = vpop.permute.xlu1 %567  ;;  %v1087_v12 = vpop.permute.xlu0 %1086 }
 0x161   : > { %676 = vst.msk [vmem:[#allocation2 + $0x128] sm:$0xff] %vm637_vm2, %v568_v21  ;;  %v2828_v23 = vpop.f32.mrf.mxu0  ;;  %v2904_v50 = vpop.f32.mrf.mxu1 }
 0x162   : > { %1196 = vst.msk [vmem:[#allocation2 + $0x120] sm:$0xff] %vm1158_vm4, %v1087_v12  ;;  %v1497_v18 = vadd.f32 %v2828_v23, %v3782_v48  ;;  %v2078_v24 = vadd.f32 %v2904_v50, %v3782_v48 }
 0x163   : > { %v1491_v25 = vpop.f32.mrf.mxu0  ;;  %v2072_v26 = vpop.f32.mrf.mxu1 }
 0x164   : > { %1731 = vst.msk [vmem:[%s3787_s28 + $0x8] sm:$0xff] %vm391_vm0, %v1497_v18  ;;  %2640 = vst.msk [vmem:[%s3787_s28 + $0x18] sm:$0xff] %vm391_vm0, %v2078_v24  ;;  %v1492_v27 = vadd.f32 %v3782_v48, %v1491_v25  ;;  %v2073_v28 = vadd.f32 %v3782_v48, %v2072_v26  ;;  %v891_v29 = vpop.permute.xlu1 %890  ;;  %v570_v22 = vpop.permute.xlu0 %569  ;;  %v1259_v52 = vld [vmem:[#allocation2 + $0x118] sm:$0xff] }
 0x165   : > { %1000 = vst.msk [vmem:[#allocation2 + $0x128] sm:$0xff] %vm769_vm3, %v891_v29  ;;  %2878 = vmatmul.mubr.msk.f32.gmra.mxu0 %vm1280_vm6, %v1259_v52  ;;  %2950 = vmatprep.mubr.msk.f32.mxu1 %vm1280_vm6, %v1259_v52 }
 0x166   : > { %677 = vst.msk [vmem:[#allocation2 + $0x130] sm:$0x1] %vm640_vm5, %v570_v22 }
 0x167   : > { %1730 = vst.msk [vmem:[%s3787_s28] sm:$0xff] %vm391_vm0, %v1492_v27  ;;  %2639 = vst.msk [vmem:[%s3787_s28 + $0x10] sm:$0xff] %vm391_vm0, %v2073_v28 }
 0x168   : > { %1763 = vst.msk [vmem:[%s3787_s28 - $0x1] sm:$0xfe] %vm1762_vm9, %v1492_v27  ;;  %2671 = vst.msk [vmem:[%s3787_s28 + $0xf] sm:$0xfe] %vm1762_vm9, %v2073_v28  ;;  %v1089_v31 = vpop.permute.xlu1 %1088  ;;  %v893_v30 = vpop.permute.xlu0 %892 }
 0x169   : > { %1764 = vst.msk [vmem:[%s3787_s28 + $0x7] sm:$0xff] %vm769_vm3, %v1497_v18  ;;  %2672 = vst.msk [vmem:[%s3787_s28 + $0x17] sm:$0xff] %vm769_vm3, %v2078_v24  ;;  %v1260_v32 = vld [vmem:[#allocation2 + $0x120] sm:$0xff] }
 0x16a   : > { %1197 = vst.msk [vmem:[#allocation2 + $0x128] sm:$0xff] %vm1158_vm4, %v1089_v31  ;;  %2880 = vmatprep.mubr.msk.f32.mxu0 %vm1280_vm6, %v1260_v32  ;;  %2951 = vmatmul.mubr.msk.f32.gmra.mxu1 %vm1280_vm6, %v1260_v32 }
 0x16b   : > { %1001 = vst.msk [vmem:[#allocation2 + $0x130] sm:$0x1] %vm772_vm7, %v893_v30 }
 0x16c   : > { %v572_v54 = vpop.permute.xlu1 %571  ;;  %v1091_v33 = vpop.permute.xlu0 %1090 }
 0x16d   : > { %678 = vst.msk [vmem:[#allocation2 + $0x138] sm:$0xff] %vm637_vm2, %v572_v54 }
 0x16e   : > { %1198 = vst.msk [vmem:[#allocation2 + $0x130] sm:$0x1] %vm1161_vm8, %v1091_v33 }
 0x170   : > { %v895_v34 = vpop.permute.xlu1 %894  ;;  %v574_v36 = vpop.permute.xlu0 %573 }
 0x171   : > { %v1261_v37 = vld [vmem:[#allocation2 + $0x128] sm:$0xff]  ;;  %1002 = vst.msk [vmem:[#allocation2 + $0x138] sm:$0xff] %vm769_vm3, %v895_v34 }
 0x172   : > { %679 = vst.msk [vmem:[#allocation2 + $0x140] sm:$0xff] %vm637_vm2, %v574_v36  ;;  %2881 = vmatmul.mubr.msk.f32.gmra.mxu0 %vm1280_vm6, %v1261_v37  ;;  %2953 = vmatprep.mubr.msk.f32.mxu1 %vm1280_vm6, %v1261_v37  ;;  %v2831_v35 = vpop.f32.mrf.mxu0 }
 0x173   : > { %v1507_v40 = vadd.f32 %v2831_v35, %v3782_v48 }
 0x174   : > { %v1093_v41 = vpop.permute.xlu1 %1092  ;;  %v897_v56 = vpop.permute.xlu0 %896 }
 0x175   : > { %v1262_v47 = vld [vmem:[#allocation2 + $0x130] sm:$0xff]  ;;  %1199 = vst.msk [vmem:[#allocation2 + $0x138] sm:$0xff] %vm1158_vm4, %v1093_v41  ;;  %v1501_v43 = vpop.f32.mrf.mxu0  ;;  %v2907_v45 = vpop.f32.mrf.mxu1 }
 0x176   : > { %1003 = vst.msk [vmem:[#allocation2 + $0x140] sm:$0xff] %vm769_vm3, %v897_v56  ;;  %2883 = vmatprep.mubr.msk.f32.mxu0 %vm1280_vm6, %v1262_v47  ;;  %2954 = vmatmul.mubr.msk.f32.gmra.mxu1 %vm1280_vm6, %v1262_v47  ;;  %v1502_v58 = vadd.f32 %v3782_v48, %v1501_v43  ;;  %v2088_v38 = vadd.f32 %v2907_v45, %v3782_v48 }
 0x177   : > { %1732 = vst.msk [vmem:[%s3787_s28 + $0x20] sm:$0xff] %vm391_vm0, %v1507_v40  ;;  %v2834_v49 = vpop.f32.mrf.mxu0  ;;  %v2082_v51 = vpop.f32.mrf.mxu1 }
 0x178   : > { %1766 = vst.msk [vmem:[%s3787_s28 + $0x1f] sm:$0xfe] %vm1762_vm9, %v1507_v40  ;;  %v2083_v53 = vadd.f32 %v3782_v48, %v2082_v51  ;;  %v576_v55 = vpop.permute.xlu1 %575  ;;  %v1095_v57 = vpop.permute.xlu0 %1094  ;;  %v1517_v61 = vadd.f32 %v2834_v49, %v3782_v48 }
 0x179   : > { %1765 = vst.msk [vmem:[%s3787_s28 + $0xf] sm:$0x1] %vm772_vm7, %v1502_v58  ;;  %v1511_v60 = vpop.f32.mrf.mxu0 }
 0x17a   : > { %2641 = vst.msk [vmem:[%s3787_s28 + $0x30] sm:$0xff] %vm391_vm0, %v2088_v38  ;;  %v1512_v59 = vadd.f32 %v3782_v48, %v1511_v60 }
 0x17b   : > { %2674 = vst.msk [vmem:[%s3787_s28 + $0x2f] sm:$0xfe] %vm1762_vm9, %v2088_v38 }
 0x17c   : > { %680 = vst.msk [vmem:[#allocation2 + $0x148] sm:$0x1] %vm640_vm5, %v576_v55  ;;  %v899_v62 = vpop.permute.xlu1 %898  ;;  %v578_v39 = vpop.permute.xlu0 %577  ;;  %v1263_v63 = vld [vmem:[#allocation2 + $0x138] sm:$0xff] }
 0x17d   : > { %1200 = vst.msk [vmem:[#allocation2 + $0x140] sm:$0xff] %vm1158_vm4, %v1095_v57  ;;  %v2837_v1 = vpop.f32.mrf.mxu0  ;;  %2884 = vmatmul.mubr.msk.f32.gmra.mxu0 %vm1280_vm6, %v1263_v63  ;;  %2956 = vmatprep.mubr.msk.f32.mxu1 %vm1280_vm6, %v1263_v63 }
 0x17e   : > { %2673 = vst.msk [vmem:[%s3787_s28 + $0x1f] sm:$0x1] %vm772_vm7, %v2083_v53  ;;  %1004 = vst.msk [vmem:[#allocation2 + $0x148] sm:$0x1] %vm772_vm7, %v899_v62  ;;  %v1527_v42 = vadd.f32 %v2837_v1, %v3782_v48 }
 0x17f   : > { %1733 = vst.msk [vmem:[%s3787_s28 + $0x28] sm:$0xff] %vm391_vm0, %v1512_v59  ;;  %v1521_v3 = vpop.f32.mrf.mxu0 }
 0x180   : > { %1767 = vst.msk [vmem:[%s3787_s28 + $0x27] sm:$0xff] %vm769_vm3, %v1512_v59  ;;  %v1522_v5 = vadd.f32 %v3782_v48, %v1521_v3  ;;  %v1097_v0 = vpop.permute.xlu1 %1096  ;;  %v901_v6 = vpop.permute.xlu0 %900 }
 0x181   : > { %1768 = vst.msk [vmem:[%s3787_s28 + $0x2f] sm:$0x1] %vm772_vm7, %v1517_v61  ;;  %v2910_v2 = vpop.f32.mrf.mxu1 }
 0x182   : > { %681 = vst.msk [vmem:[#allocation2 + $0x150] sm:$0xff] %vm637_vm2, %v578_v39  ;;  %v2098_v13 = vadd.f32 %v2910_v2, %v3782_v48 }
 0x183   : > { %1735 = vst.msk [vmem:[%s3787_s28 + $0x48] sm:$0xff] %vm391_vm0, %v1527_v42  ;;  %1734 = vst.msk [vmem:[%s3787_s28 + $0x40] sm:$0xff] %vm391_vm0, %v1522_v5  ;;  %v2092_v9 = vpop.f32.mrf.mxu1 }
 0x184   : > { %v1264_v7 = vld [vmem:[#allocation2 + $0x140] sm:$0xff]  ;;  %1201 = vst.msk [vmem:[#allocation2 + $0x148] sm:$0x1] %vm1161_vm8, %v1097_v0  ;;  %v2093_v10 = vadd.f32 %v3782_v48, %v2092_v9  ;;  %v580_v44 = vpop.permute.xlu1 %579  ;;  %v1099_v11 = vpop.permute.xlu0 %1098 }
 0x185   : > { %1005 = vst.msk [vmem:[#allocation2 + $0x150] sm:$0xff] %vm769_vm3, %v901_v6  ;;  %2886 = vmatprep.mubr.msk.f32.mxu0 %vm1280_vm6, %v1264_v7  ;;  %2957 = vmatmul.mubr.msk.f32.gmra.mxu1 %vm1280_vm6, %v1264_v7  ;;  %1770 = vst.msk [vmem:[%s3787_s28 + $0x47] sm:$0xff] %vm769_vm3, %v1527_v42 }
 0x186   : > { %1769 = vst.msk [vmem:[%s3787_s28 + $0x3f] sm:$0xfe] %vm1762_vm9, %v1522_v5 }
 0x187   : > { %682 = vst.msk [vmem:[#allocation2 + $0x158] sm:$0xff] %vm637_vm2, %v580_v44 }
 0x188   : > { %1202 = vst.msk [vmem:[#allocation2 + $0x150] sm:$0xff] %vm1158_vm4, %v1099_v11  ;;  %v903_v46 = vpop.permute.xlu1 %902  ;;  %v582_v4 = vpop.permute.xlu0 %581 }
 0x189   : > { %2642 = vst.msk [vmem:[%s3787_s28 + $0x38] sm:$0xff] %vm391_vm0, %v2093_v10  ;;  %v2840_v15 = vpop.f32.mrf.mxu0 }
 0x18a   : > { %2675 = vst.msk [vmem:[%s3787_s28 + $0x37] sm:$0xff] %vm769_vm3, %v2093_v10  ;;  %1006 = vst.msk [vmem:[#allocation2 + $0x158] sm:$0xff] %vm769_vm3, %v903_v46  ;;  %v1537_v8 = vadd.f32 %v2840_v15, %v3782_v48 }
 0x18b   : > { %2676 = vst.msk [vmem:[%s3787_s28 + $0x3f] sm:$0x1] %vm772_vm7, %v2098_v13  ;;  %v1265_v14 = vld [vmem:[#allocation2 + $0x148] sm:$0xff]  ;;  %v1531_v16 = vpop.f32.mrf.mxu0 }
 0x18c   : > { %683 = vst.msk [vmem:[#allocation2 + $0x160] sm:$0x1] %vm640_vm5, %v582_v4  ;;  %2887 = vmatmul.mubr.msk.f32.gmra.mxu0 %vm1280_vm6, %v1265_v14  ;;  %2959 = vmatprep.mubr.msk.f32.mxu1 %vm1280_vm6, %v1265_v14  ;;  %v1101_v17 = vpop.permute.xlu1 %1100  ;;  %v905_v19 = vpop.permute.xlu0 %904  ;;  %v1532_v20 = vadd.f32 %v3782_v48, %v1531_v16 }
 0x18d   : > { %1736 = vst.msk [vmem:[%s3787_s28 + $0x60] sm:$0xff] %vm391_vm0, %v1537_v8  ;;  %v2913_v12 = vpop.f32.mrf.mxu1 }
 0x18e   : > { %1772 = vst.msk [vmem:[%s3787_s28 + $0x5f] sm:$0xfe] %vm1762_vm9, %v1537_v8  ;;  %v2108_v23 = vadd.f32 %v2913_v12, %v3782_v48 }
 0x18f   : > { %v1266_v21 = vld [vmem:[#allocation2 + $0x150] sm:$0xff]  ;;  %1203 = vst.msk [vmem:[#allocation2 + $0x158] sm:$0xff] %vm1158_vm4, %v1101_v17  ;;  %v2102_v50 = vpop.f32.mrf.mxu1 }
 0x190   : > { %1007 = vst.msk [vmem:[#allocation2 + $0x160] sm:$0x1] %vm772_vm7, %v905_v19  ;;  %2889 = vmatprep.mubr.msk.f32.mxu0 %vm1280_vm6, %v1266_v21  ;;  %2960 = vmatmul.mubr.msk.f32.gmra.mxu1 %vm1280_vm6, %v1266_v21  ;;  %1771 = vst.msk [vmem:[%s3787_s28 + $0x4f] sm:$0x1] %vm772_vm7, %v1532_v20  ;;  %v2103_v18 = vadd.f32 %v3782_v48, %v2102_v50  ;;  %v584_v24 = vpop.permute.xlu1 %583  ;;  %v1103_v25 = vpop.permute.xlu0 %1102 }
 0x191   : > { %2644 = vst.msk [vmem:[%s3787_s28 + $0x58] sm:$0xff] %vm391_vm0, %v2108_v23 }
 0x192   : > { %684 = vst.msk [vmem:[#allocation2 + $0x168] sm:$0xff] %vm637_vm2, %v584_v24 }
 0x193   : > { %1204 = vst.msk [vmem:[#allocation2 + $0x160] sm:$0x1] %vm1161_vm8, %v1103_v25 }
 0x194   : > { %2643 = vst.msk [vmem:[%s3787_s28 + $0x50] sm:$0xff] %vm391_vm0, %v2103_v18  ;;  %v907_v26 = vpop.permute.xlu1 %906  ;;  %v586_v27 = vpop.permute.xlu0 %585 }
 0x195   : > { %2677 = vst.msk [vmem:[%s3787_s28 + $0x4f] sm:$0xfe] %vm1762_vm9, %v2103_v18  ;;  %v2843_v29 = vpop.f32.mrf.mxu0 }
 0x196   : > { %2678 = vst.msk [vmem:[%s3787_s28 + $0x57] sm:$0xff] %vm769_vm3, %v2108_v23  ;;  %v1267_v28 = vld [vmem:[#allocation2 + $0x158] sm:$0xff]  ;;  %1008 = vst.msk [vmem:[#allocation2 + $0x168] sm:$0xff] %vm769_vm3, %v907_v26  ;;  %v1547_v22 = vadd.f32 %v2843_v29, %v3782_v48 }
 0x197   : > { %685 = vst.msk [vmem:[#allocation2 + $0x170] sm:$0xff] %vm637_vm2, %v586_v27  ;;  %2890 = vmatmul.mubr.msk.f32.gmra.mxu0 %vm1280_vm6, %v1267_v28  ;;  %2962 = vmatprep.mubr.msk.f32.mxu1 %vm1280_vm6, %v1267_v28  ;;  %v1541_v52 = vpop.f32.mrf.mxu0 }
 0x198   : > { %v1542_v31 = vadd.f32 %v3782_v48, %v1541_v52  ;;  %v1105_v30 = vpop.permute.xlu1 %1104  ;;  %v909_v32 = vpop.permute.xlu0 %908 }
 0x199   : > { %1205 = vst.msk [vmem:[#allocation2 + $0x168] sm:$0xff] %vm1158_vm4, %v1105_v30  ;;  %v2916_v33 = vpop.f32.mrf.mxu1 }
 0x19a   : > { %v1268_v54 = vld [vmem:[#allocation2 + $0x160] sm:$0xff]  ;;  %1009 = vst.msk [vmem:[#allocation2 + $0x170] sm:$0xff] %vm769_vm3, %v909_v32  ;;  %v2118_v34 = vadd.f32 %v2916_v33, %v3782_v48 }
 0x19b   : > { %2892 = vmatprep.mubr.msk.f32.mxu0 %vm1280_vm6, %v1268_v54  ;;  %2963 = vmatmul.mubr.msk.f32.gmra.mxu1 %vm1280_vm6, %v1268_v54  ;;  %1737 = vst.msk [vmem:[%s3787_s28 + $0x68] sm:$0xff] %vm391_vm0, %v1542_v31  ;;  %v2112_v36 = vpop.f32.mrf.mxu1 }
 0x19c   : > { %1773 = vst.msk [vmem:[%s3787_s28 + $0x67] sm:$0xff] %vm769_vm3, %v1542_v31  ;;  %v2113_v37 = vadd.f32 %v3782_v48, %v2112_v36  ;;  %v588_v35 = vpop.permute.xlu1 %587  ;;  %v1107_v40 = vpop.permute.xlu0 %1106 }
 0x19d   : > { %1774 = vst.msk [vmem:[%s3787_s28 + $0x6f] sm:$0x1] %vm772_vm7, %v1547_v22 }
 0x19e   : > { %2645 = vst.msk [vmem:[%s3787_s28 + $0x70] sm:$0xff] %vm391_vm0, %v2118_v34 }
 0x19f   : > { %2680 = vst.msk [vmem:[%s3787_s28 + $0x6f] sm:$0xfe] %vm1762_vm9, %v2118_v34 }
 0x1a0   : > { %686 = vst.msk [vmem:[#allocation2 + $0x178] sm:$0x1] %vm640_vm5, %v588_v35  ;;  %v911_v41 = vpop.permute.xlu1 %910  ;;  %v691_v56 = vpop.permute.xlu0 %690  ;;  %v1269_v47 = vld [vmem:[#allocation2 + $0x168] sm:$0xff] }
 0x1a1   : > { %1206 = vst.msk [vmem:[#allocation2 + $0x170] sm:$0xff] %vm1158_vm4, %v1107_v40  ;;  %v2846_v43 = vpop.f32.mrf.mxu0  ;;  %2893 = vmatmul.mubr.msk.f32.gmra.mxu0 %vm1280_vm6, %v1269_v47  ;;  %2965 = vmatprep.mubr.msk.f32.mxu1 %vm1280_vm6, %v1269_v47 }
 0x1a2   : > { %2679 = vst.msk [vmem:[%s3787_s28 + $0x5f] sm:$0x1] %vm772_vm7, %v2113_v37  ;;  %1010 = vst.msk [vmem:[#allocation2 + $0x178] sm:$0x1] %vm772_vm7, %v911_v41  ;;  %v1557_v45 = vadd.f32 %v2846_v43, %v3782_v48 }
 0x1a3   : > { %700 = vst.msk [vmem:[#allocation2 + $0x180] sm:$0xff] %vm637_vm2, %v691_v56  ;;  %v1551_v58 = vpop.f32.mrf.mxu0 }
 0x1a4   : > { %1739 = vst.msk [vmem:[%s3787_s28 + $0x88] sm:$0xff] %vm391_vm0, %v1557_v45  ;;  %v1552_v38 = vadd.f32 %v3782_v48, %v1551_v58  ;;  %v1109_v49 = vpop.permute.xlu1 %1108  ;;  %v913_v51 = vpop.permute.xlu0 %912 }
 0x1a5   : > { %1207 = vst.msk [vmem:[#allocation2 + $0x178] sm:$0x1] %vm1161_vm8, %v1109_v49  ;;  %v2919_v55 = vpop.f32.mrf.mxu1 }
 0x1a6   : > { %1011 = vst.msk [vmem:[#allocation2 + $0x180] sm:$0xff] %vm769_vm3, %v913_v51  ;;  %v2128_v62 = vadd.f32 %v2919_v55, %v3782_v48 }
 0x1a7   : > { %1738 = vst.msk [vmem:[%s3787_s28 + $0x80] sm:$0xff] %vm391_vm0, %v1552_v38  ;;  %v2122_v57 = vpop.f32.mrf.mxu1 }
 0x1a8   : > { %v1270_v53 = vld [vmem:[#allocation2 + $0x170] sm:$0xff]  ;;  %1775 = vst.msk [vmem:[%s3787_s28 + $0x7f] sm:$0xfe] %vm1762_vm9, %v1552_v38  ;;  %v2123_v60 = vadd.f32 %v3782_v48, %v2122_v57  ;;  %v1212_v59 = vpop.permute.xlu0 %1211  ;;  %v693_v61 = vpop.permute.xlu1 %692 }
 0x1a9   : > { %2895 = vmatprep.mubr.msk.f32.mxu0 %vm1280_vm6, %v1270_v53  ;;  %2966 = vmatmul.mubr.msk.f32.gmra.mxu1 %vm1280_vm6, %v1270_v53  ;;  %1776 = vst.msk [vmem:[%s3787_s28 + $0x87] sm:$0xff] %vm769_vm3, %v1557_v45 }
 0x1aa   : > { %1220 = vst.msk [vmem:[#allocation2 + $0x180] sm:$0xff] %vm1158_vm4, %v1212_v59 }
 0x1ab   : > { %701 = vst.msk [vmem:[#allocation2 + $0x188] sm:$0xff] %vm637_vm2, %v693_v61 }
 0x1ac   : > { %2646 = vst.msk [vmem:[%s3787_s28 + $0x78] sm:$0xff] %vm391_vm0, %v2123_v60  ;;  %v695_v39 = vpop.permute.xlu0 %694  ;;  %v1271_v63 = vld [vmem:[#allocation2 + $0x178] sm:$0xff]  ;;  %v915_v1 = vpop.permute.xlu1 %914 }
 0x1ad   : > { %2681 = vst.msk [vmem:[%s3787_s28 + $0x77] sm:$0xff] %vm769_vm3, %v2123_v60  ;;  %2896 = vmatmul.mubr.msk.f32.gmra.mxu0 %vm1280_vm6, %v1271_v63  ;;  %v2849_v42 = vpop.f32.mrf.mxu0  ;;  %1012 = vst.msk [vmem:[#allocation2 + $0x188] sm:$0xff] %vm769_vm3, %v915_v1  ;;  %2968 = vmatprep.mubr.msk.f32.mxu1 %vm1280_vm6, %v1271_v63 }
 0x1ae   : > { %2682 = vst.msk [vmem:[%s3787_s28 + $0x7f] sm:$0x1] %vm772_vm7, %v2128_v62  ;;  %v1567_v3 = vadd.f32 %v2849_v42, %v3782_v48 }
 0x1af   : > { %702 = vst.msk [vmem:[#allocation2 + $0x190] sm:$0x1] %vm640_vm5, %v695_v39  ;;  %v1561_v5 = vpop.f32.mrf.mxu0 }
 0x1b0   : > { %1740 = vst.msk [vmem:[%s3787_s28 + $0xa0] sm:$0xff] %vm391_vm0, %v1567_v3  ;;  %v917_v0 = vpop.permute.xlu0 %916  ;;  %v1562_v6 = vadd.f32 %v3782_v48, %v1561_v5  ;;  %v1214_v2 = vpop.permute.xlu1 %1213 }
 0x1b1   : > { %v1856_v7 = vld [vmem:[#allocation2 + $0x180] sm:$0xff]  ;;  %1778 = vst.msk [vmem:[%s3787_s28 + $0x9f] sm:$0xfe] %vm1762_vm9, %v1567_v3  ;;  %v2922_v9 = vpop.f32.mrf.mxu1 }
 0x1b2   : > { %1013 = vst.msk [vmem:[#allocation2 + $0x190] sm:$0x1] %vm772_vm7, %v917_v0  ;;  %2969 = vmatmul.mubr.msk.f32.gmra.mxu1 %vm1280_vm6, %v1856_v7  ;;  %1777 = vst.msk [vmem:[%s3787_s28 + $0x8f] sm:$0x1] %vm772_vm7, %v1562_v6  ;;  %v2138_v10 = vadd.f32 %v2922_v9, %v3782_v48 }
 0x1b3   : > { %1221 = vst.msk [vmem:[#allocation2 + $0x188] sm:$0xff] %vm1158_vm4, %v1214_v2  ;;  %v2132_v44 = vpop.f32.mrf.mxu1 }
 0x1b4   : > { %2648 = vst.msk [vmem:[%s3787_s28 + $0x98] sm:$0xff] %vm391_vm0, %v2138_v10  ;;  %v2133_v11 = vadd.f32 %v3782_v48, %v2132_v44  ;;  %v1216_v13 = vpop.permute.xlu0 %1215 }
 0x1b5   : > { %1222 = vst.msk [vmem:[#allocation2 + $0x190] sm:$0x1] %vm1161_vm8, %v1216_v13 }
 0x1b6   : > { %2647 = vst.msk [vmem:[%s3787_s28 + $0x90] sm:$0xff] %vm391_vm0, %v2133_v11 }
 0x1b7   : > { %2683 = vst.msk [vmem:[%s3787_s28 + $0x8f] sm:$0xfe] %vm1762_vm9, %v2133_v11 }
 0x1b8   : > { %2684 = vst.msk [vmem:[%s3787_s28 + $0x97] sm:$0xff] %vm769_vm3, %v2138_v10  ;;  %v2852_v4 = vpop.f32.mrf.mxu0 }
 0x1b9   : > { %v1577_v14 = vadd.f32 %v2852_v4, %v3782_v48 }
 0x1ba   : > { %v1857_v46 = vld [vmem:[#allocation2 + $0x188] sm:$0xff]  ;;  %v1571_v15 = vpop.f32.mrf.mxu0 }
 0x1bb   : > { %2971 = vmatprep.mubr.msk.f32.mxu1 %vm1280_vm6, %v1857_v46  ;;  %v1572_v8 = vadd.f32 %v3782_v48, %v1571_v15 }
 0x1bc   : > { %v1858_v16 = vld [vmem:[#allocation2 + $0x190] sm:$0xff] }
 0x1bd   : > { %v2925_v17 = vpop.f32.mrf.mxu1  ;;  %2972 = vmatmul.mubr.msk.f32.gmra.mxu1 %vm1280_vm6, %v1858_v16  ;;  %1741 = vst.msk [vmem:[%s3787_s28 + $0xa8] sm:$0xff] %vm391_vm0, %v1572_v8 }
 0x1be   : > { %v2148_v19 = vadd.f32 %v2925_v17, %v3782_v48  ;;  %1779 = vst.msk [vmem:[%s3787_s28 + $0xa7] sm:$0xff] %vm769_vm3, %v1572_v8 }
 0x1bf   : > { %1780 = vst.msk [vmem:[%s3787_s28 + $0xaf] sm:$0x1] %vm772_vm7, %v1577_v14  ;;  %v2142_v20 = vpop.f32.mrf.mxu1 }
 0x1c0   : > { %2649 = vst.msk [vmem:[%s3787_s28 + $0xb0] sm:$0xff] %vm391_vm0, %v2148_v19  ;;  %v2143_v21 = vadd.f32 %v3782_v48, %v2142_v20 }
 0x1c1   : > { %2686 = vst.msk [vmem:[%s3787_s28 + $0xaf] sm:$0xfe] %vm1762_vm9, %v2148_v19 }
 0x1c2   : > { %2685 = vst.msk [vmem:[%s3787_s28 + $0x9f] sm:$0x1] %vm772_vm7, %v2143_v21 }
 0x1c4   : > { %v2855_v12 = vpop.f32.mrf.mxu0 }
 0x1c5   : > { %v1587_v23 = vadd.f32 %v2855_v12, %v3782_v48 }
 0x1c6   : > { %v1581_v50 = vpop.f32.mrf.mxu0 }
 0x1c7   : > { %1743 = vst.msk [vmem:[%s3787_s28 + $0xc8] sm:$0xff] %vm391_vm0, %v1587_v23  ;;  %v1582_v18 = vadd.f32 %v3782_v48, %v1581_v50 }
 0x1c9   : > { %v2928_v24 = vpop.f32.mrf.mxu1  ;;  %1742 = vst.msk [vmem:[%s3787_s28 + $0xc0] sm:$0xff] %vm391_vm0, %v1582_v18 }
 0x1ca   : > { %1781 = vst.msk [vmem:[%s3787_s28 + $0xbf] sm:$0xfe] %vm1762_vm9, %v1582_v18  ;;  %v2158_v27 = vadd.f32 %v2928_v24, %v3782_v48 }
 0x1cb   : > { %1782 = vst.msk [vmem:[%s3787_s28 + $0xc7] sm:$0xff] %vm769_vm3, %v1587_v23  ;;  %v2152_v25 = vpop.f32.mrf.mxu1 }
 0x1cc   : > { %v2153_v26 = vadd.f32 %v3782_v48, %v2152_v25 }
 0x1ce   : > { %2650 = vst.msk [vmem:[%s3787_s28 + $0xb8] sm:$0xff] %vm391_vm0, %v2153_v26 }
 0x1cf   : > { %2687 = vst.msk [vmem:[%s3787_s28 + $0xb7] sm:$0xff] %vm769_vm3, %v2153_v26 }
 0x1d0   : > { %2688 = vst.msk [vmem:[%s3787_s28 + $0xbf] sm:$0x1] %vm772_vm7, %v2158_v27  ;;  %v2858_v28 = vpop.f32.mrf.mxu0 }
 0x1d1   : > { %v1597_v29 = vadd.f32 %v2858_v28, %v3782_v48 }
 0x1d2   : > { %v1591_v22 = vpop.f32.mrf.mxu0 }
 0x1d3   : > { %1744 = vst.msk [vmem:[%s3787_s28 + $0xe0] sm:$0xff] %vm391_vm0, %v1597_v29  ;;  %v1592_v52 = vadd.f32 %v3782_v48, %v1591_v22 }
 0x1d4   : > { %1784 = vst.msk [vmem:[%s3787_s28 + $0xdf] sm:$0xfe] %vm1762_vm9, %v1597_v29 }
 0x1d5   : > { %v2931_v31 = vpop.f32.mrf.mxu1  ;;  %1783 = vst.msk [vmem:[%s3787_s28 + $0xcf] sm:$0x1] %vm772_vm7, %v1592_v52 }
 0x1d6   : > { %v2168_v30 = vadd.f32 %v2931_v31, %v3782_v48 }
 0x1d7   : > { %v2162_v32 = vpop.f32.mrf.mxu1 }
 0x1d8   : > { %2652 = vst.msk [vmem:[%s3787_s28 + $0xd8] sm:$0xff] %vm391_vm0, %v2168_v30  ;;  %v2163_v54 = vadd.f32 %v3782_v48, %v2162_v32 }
 0x1da   : > { %2651 = vst.msk [vmem:[%s3787_s28 + $0xd0] sm:$0xff] %vm391_vm0, %v2163_v54 }
 0x1db   : > { %2689 = vst.msk [vmem:[%s3787_s28 + $0xcf] sm:$0xfe] %vm1762_vm9, %v2163_v54 }
 0x1dc   : > { %2690 = vst.msk [vmem:[%s3787_s28 + $0xd7] sm:$0xff] %vm769_vm3, %v2168_v30  ;;  %v2861_v33 = vpop.f32.mrf.mxu0 }
 0x1dd   : > { %v1607_v34 = vadd.f32 %v2861_v33, %v3782_v48 }
 0x1de   : > { %v1601_v36 = vpop.f32.mrf.mxu0 }
 0x1df   : > { %v1602_v37 = vadd.f32 %v3782_v48, %v1601_v36 }
 0x1e1   : > { %v2934_v35 = vpop.f32.mrf.mxu1  ;;  %1745 = vst.msk [vmem:[%s3787_s28 + $0xe8] sm:$0xff] %vm391_vm0, %v1602_v37 }
 0x1e2   : > { %v2178_v40 = vadd.f32 %v2934_v35, %v3782_v48  ;;  %1785 = vst.msk [vmem:[%s3787_s28 + $0xe7] sm:$0xff] %vm769_vm3, %v1602_v37 }
 0x1e3   : > { %1786 = vst.msk [vmem:[%s3787_s28 + $0xef] sm:$0x1] %vm772_vm7, %v1607_v34  ;;  %v2172_v41 = vpop.f32.mrf.mxu1 }
 0x1e4   : > { %2653 = vst.msk [vmem:[%s3787_s28 + $0xf0] sm:$0xff] %vm391_vm0, %v2178_v40  ;;  %v2173_v56 = vadd.f32 %v3782_v48, %v2172_v41 }
 0x1e5   : > { %2692 = vst.msk [vmem:[%s3787_s28 + $0xef] sm:$0xfe] %vm1762_vm9, %v2178_v40 }
 0x1e6   : > { %2691 = vst.msk [vmem:[%s3787_s28 + $0xdf] sm:$0x1] %vm772_vm7, %v2173_v56 }
 0x1e8   : > { %v2864_v47 = vpop.f32.mrf.mxu0 }
 0x1e9   : > { %v1617_v43 = vadd.f32 %v2864_v47, %v3782_v48 }
 0x1ea   : > { %v1611_v45 = vpop.f32.mrf.mxu0 }
 0x1eb   : > { %1747 = vst.msk [vmem:[%s3787_s28 + $0x108] sm:$0xff] %vm391_vm0, %v1617_v43  ;;  %v1612_v58 = vadd.f32 %v3782_v48, %v1611_v45 }
 0x1ed   : > { %v2937_v38 = vpop.f32.mrf.mxu1  ;;  %1746 = vst.msk [vmem:[%s3787_s28 + $0x100] sm:$0xff] %vm391_vm0, %v1612_v58 }
 0x1ee   : > { %1787 = vst.msk [vmem:[%s3787_s28 + $0xff] sm:$0xfe] %vm1762_vm9, %v1612_v58  ;;  %v2188_v53 = vadd.f32 %v2937_v38, %v3782_v48 }
 0x1ef   : > { %1788 = vst.msk [vmem:[%s3787_s28 + $0x107] sm:$0xff] %vm769_vm3, %v1617_v43  ;;  %v2182_v49 = vpop.f32.mrf.mxu1 }
 0x1f0   : > { %v2183_v51 = vadd.f32 %v3782_v48, %v2182_v49 }
 0x1f2   : > { %2654 = vst.msk [vmem:[%s3787_s28 + $0xf8] sm:$0xff] %vm391_vm0, %v2183_v51 }
 0x1f3   : > { %2693 = vst.msk [vmem:[%s3787_s28 + $0xf7] sm:$0xff] %vm769_vm3, %v2183_v51 }
 0x1f4   : > { %2694 = vst.msk [vmem:[%s3787_s28 + $0xff] sm:$0x1] %vm772_vm7, %v2188_v53  ;;  %v2867_v55 = vpop.f32.mrf.mxu0 }
 0x1f5   : > { %v1627_v57 = vadd.f32 %v2867_v55, %v3782_v48 }
 0x1f6   : > { %v1621_v60 = vpop.f32.mrf.mxu0 }
 0x1f7   : > { %1748 = vst.msk [vmem:[%s3787_s28 + $0x120] sm:$0xff] %vm391_vm0, %v1627_v57  ;;  %v1622_v59 = vadd.f32 %v3782_v48, %v1621_v60 }
 0x1f8   : > { %1790 = vst.msk [vmem:[%s3787_s28 + $0x11f] sm:$0xfe] %vm1762_vm9, %v1627_v57 }
 0x1f9   : > { %v2940_v61 = vpop.f32.mrf.mxu1  ;;  %1789 = vst.msk [vmem:[%s3787_s28 + $0x10f] sm:$0x1] %vm772_vm7, %v1622_v59 }
 0x1fa   : > { %v2198_v62 = vadd.f32 %v2940_v61, %v3782_v48 }
 0x1fb   : > { %v2192_v39 = vpop.f32.mrf.mxu1 }
 0x1fc   : > { %2656 = vst.msk [vmem:[%s3787_s28 + $0x118] sm:$0xff] %vm391_vm0, %v2198_v62  ;;  %v2193_v63 = vadd.f32 %v3782_v48, %v2192_v39 }
 0x1fe   : > { %2655 = vst.msk [vmem:[%s3787_s28 + $0x110] sm:$0xff] %vm391_vm0, %v2193_v63 }
 0x1ff   : > { %2695 = vst.msk [vmem:[%s3787_s28 + $0x10f] sm:$0xfe] %vm1762_vm9, %v2193_v63 }
 0x200   : > { %2696 = vst.msk [vmem:[%s3787_s28 + $0x117] sm:$0xff] %vm769_vm3, %v2198_v62 }
 0x201   : > { %v2870_v1 = vpop.f32.mrf.mxu0 }
 0x202   : > { %v1637_v42 = vadd.f32 %v2870_v1, %v3782_v48 }
 0x203   : > { %v1631_v3 = vpop.f32.mrf.mxu0 }
 0x204   : > { %v1632_v5 = vadd.f32 %v3782_v48, %v1631_v3 }
 0x206   : > { %v2943_v0 = vpop.f32.mrf.mxu1  ;;  %1749 = vst.msk [vmem:[%s3787_s28 + $0x128] sm:$0xff] %vm391_vm0, %v1632_v5 }
 0x207   : > { %v2208_v6 = vadd.f32 %v2943_v0, %v3782_v48  ;;  %1791 = vst.msk [vmem:[%s3787_s28 + $0x127] sm:$0xff] %vm769_vm3, %v1632_v5 }
 0x208   : > { %1792 = vst.msk [vmem:[%s3787_s28 + $0x12f] sm:$0x1] %vm772_vm7, %v1637_v42  ;;  %v2202_v7 = vpop.f32.mrf.mxu1 }
 0x209   : > { %2657 = vst.msk [vmem:[%s3787_s28 + $0x130] sm:$0xff] %vm391_vm0, %v2208_v6  ;;  %v2203_v2 = vadd.f32 %v3782_v48, %v2202_v7 }
 0x20a   : > { %2698 = vst.msk [vmem:[%s3787_s28 + $0x12f] sm:$0xfe] %vm1762_vm9, %v2208_v6 }
 0x20b   : > { %2697 = vst.msk [vmem:[%s3787_s28 + $0x11f] sm:$0x1] %vm772_vm7, %v2203_v2 }
 0x20d   : > { %v2873_v9 = vpop.f32.mrf.mxu0 }
 0x20e   : > { %v1647_v10 = vadd.f32 %v2873_v9, %v3782_v48 }
 0x20f   : > { %v1641_v44 = vpop.f32.mrf.mxu0 }
 0x210   : > { %1751 = vst.msk [vmem:[%s3787_s28 + $0x148] sm:$0xff] %vm391_vm0, %v1647_v10  ;;  %v1642_v11 = vadd.f32 %v3782_v48, %v1641_v44 }
 0x212   : > { %v2946_v13 = vpop.f32.mrf.mxu1  ;;  %1750 = vst.msk [vmem:[%s3787_s28 + $0x140] sm:$0xff] %vm391_vm0, %v1642_v11 }
 0x213   : > { %1793 = vst.msk [vmem:[%s3787_s28 + $0x13f] sm:$0xfe] %vm1762_vm9, %v1642_v11  ;;  %v2218_v14 = vadd.f32 %v2946_v13, %v3782_v48 }
 0x214   : > { %1794 = vst.msk [vmem:[%s3787_s28 + $0x147] sm:$0xff] %vm769_vm3, %v1647_v10  ;;  %v2212_v46 = vpop.f32.mrf.mxu1 }
 0x215   : > { %v2213_v4 = vadd.f32 %v3782_v48, %v2212_v46 }
 0x217   : > { %2658 = vst.msk [vmem:[%s3787_s28 + $0x138] sm:$0xff] %vm391_vm0, %v2213_v4 }
 0x218   : > { %2699 = vst.msk [vmem:[%s3787_s28 + $0x137] sm:$0xff] %vm769_vm3, %v2213_v4 }
 0x219   : > { %2700 = vst.msk [vmem:[%s3787_s28 + $0x13f] sm:$0x1] %vm772_vm7, %v2218_v14  ;;  %v2876_v15 = vpop.f32.mrf.mxu0 }
 0x21a   : > { %v1657_v8 = vadd.f32 %v2876_v15, %v3782_v48 }
 0x21b   : > { %v1651_v16 = vpop.f32.mrf.mxu0 }
 0x21c   : > { %1752 = vst.msk [vmem:[%s3787_s28 + $0x160] sm:$0xff] %vm391_vm0, %v1657_v8  ;;  %v1652_v17 = vadd.f32 %v3782_v48, %v1651_v16 }
 0x21d   : > { %1796 = vst.msk [vmem:[%s3787_s28 + $0x15f] sm:$0xfe] %vm1762_vm9, %v1657_v8 }
 0x21e   : > { %v2949_v19 = vpop.f32.mrf.mxu1  ;;  %1795 = vst.msk [vmem:[%s3787_s28 + $0x14f] sm:$0x1] %vm772_vm7, %v1652_v17 }
 0x21f   : > { %v2228_v20 = vadd.f32 %v2949_v19, %v3782_v48 }
 0x220   : > { %v2222_v21 = vpop.f32.mrf.mxu1 }
 0x221   : > { %2660 = vst.msk [vmem:[%s3787_s28 + $0x158] sm:$0xff] %vm391_vm0, %v2228_v20  ;;  %v2223_v12 = vadd.f32 %v3782_v48, %v2222_v21 }
 0x223   : > { %2659 = vst.msk [vmem:[%s3787_s28 + $0x150] sm:$0xff] %vm391_vm0, %v2223_v12 }
 0x224   : > { %2701 = vst.msk [vmem:[%s3787_s28 + $0x14f] sm:$0xfe] %vm1762_vm9, %v2223_v12 }
 0x225   : > { %2702 = vst.msk [vmem:[%s3787_s28 + $0x157] sm:$0xff] %vm769_vm3, %v2228_v20  ;;  %v2879_v23 = vpop.f32.mrf.mxu0 }
 0x226   : > { %v1667_v50 = vadd.f32 %v2879_v23, %v3782_v48 }
 0x227   : > { %v1661_v18 = vpop.f32.mrf.mxu0 }
 0x228   : > { %v1662_v24 = vadd.f32 %v3782_v48, %v1661_v18 }
 0x22a   : > { %v2952_v25 = vpop.f32.mrf.mxu1  ;;  %1753 = vst.msk [vmem:[%s3787_s28 + $0x168] sm:$0xff] %vm391_vm0, %v1662_v24 }
 0x22b   : > { %v2238_v26 = vadd.f32 %v2952_v25, %v3782_v48  ;;  %1797 = vst.msk [vmem:[%s3787_s28 + $0x167] sm:$0xff] %vm769_vm3, %v1662_v24 }
 0x22c   : > { %1798 = vst.msk [vmem:[%s3787_s28 + $0x16f] sm:$0x1] %vm772_vm7, %v1667_v50  ;;  %v2232_v27 = vpop.f32.mrf.mxu1 }
 0x22d   : > { %2661 = vst.msk [vmem:[%s3787_s28 + $0x170] sm:$0xff] %vm391_vm0, %v2238_v26  ;;  %v2233_v28 = vadd.f32 %v3782_v48, %v2232_v27 }
 0x22e   : > { %2704 = vst.msk [vmem:[%s3787_s28 + $0x16f] sm:$0xfe] %vm1762_vm9, %v2238_v26 }
 0x22f   : > { %2703 = vst.msk [vmem:[%s3787_s28 + $0x15f] sm:$0x1] %vm772_vm7, %v2233_v28 }
 0x232   : > { %v2882_v29 = vpop.f32.mrf.mxu0 }
 0x233   : > { %v1677_v22 = vadd.f32 %v2882_v29, %v3782_v48 }
 0x234   : > { %v1671_v52 = vpop.f32.mrf.mxu0 }
 0x235   : > { %1755 = vst.msk [vmem:[%s3787_s28 + $0x188] sm:$0xff] %vm391_vm0, %v1677_v22  ;;  %v1672_v31 = vadd.f32 %v3782_v48, %v1671_v52 }
 0x236   : > { %v2955_v30 = vpop.f32.mrf.mxu1 }
 0x237   : > { %1754 = vst.msk [vmem:[%s3787_s28 + $0x180] sm:$0xff] %vm391_vm0, %v1672_v31  ;;  %v2248_v33 = vadd.f32 %v2955_v30, %v3782_v48 }
 0x238   : > { %1799 = vst.msk [vmem:[%s3787_s28 + $0x17f] sm:$0xfe] %vm1762_vm9, %v1672_v31  ;;  %v2242_v32 = vpop.f32.mrf.mxu1 }
 0x239   : > { %1800 = vst.msk [vmem:[%s3787_s28 + $0x187] sm:$0xff] %vm769_vm3, %v1677_v22  ;;  %v2243_v54 = vadd.f32 %v3782_v48, %v2242_v32 }
 0x23b   : > { %2662 = vst.msk [vmem:[%s3787_s28 + $0x178] sm:$0xff] %vm391_vm0, %v2243_v54 }
 0x23c   : > { %2705 = vst.msk [vmem:[%s3787_s28 + $0x177] sm:$0xff] %vm769_vm3, %v2243_v54 }
 0x23d   : > { %2706 = vst.msk [vmem:[%s3787_s28 + $0x17f] sm:$0x1] %vm772_vm7, %v2248_v33  ;;  %v2885_v34 = vpop.f32.mrf.mxu0 }
 0x23e   : > { %v1687_v36 = vadd.f32 %v2885_v34, %v3782_v48 }
 0x23f   : > { %v1681_v37 = vpop.f32.mrf.mxu0 }
 0x240   : > { %1756 = vst.msk [vmem:[%s3787_s28 + $0x1a0] sm:$0xff] %vm391_vm0, %v1687_v36  ;;  %v1682_v35 = vadd.f32 %v3782_v48, %v1681_v37 }
 0x241   : > { %1802 = vst.msk [vmem:[%s3787_s28 + $0x19f] sm:$0xfe] %vm1762_vm9, %v1687_v36 }
 0x242   : > { %1801 = vst.msk [vmem:[%s3787_s28 + $0x18f] sm:$0x1] %vm772_vm7, %v1682_v35 }
 0x245   : > { %v2958_v40 = vpop.f32.mrf.mxu1 }
 0x246   : > { %v2258_v41 = vadd.f32 %v2958_v40, %v3782_v48 }
 0x247   : > { %v2252_v56 = vpop.f32.mrf.mxu1 }
 0x248   : > { %2664 = vst.msk [vmem:[%s3787_s28 + $0x198] sm:$0xff] %vm391_vm0, %v2258_v41  ;;  %v2253_v47 = vadd.f32 %v3782_v48, %v2252_v56 }
 0x24a   : > { %2663 = vst.msk [vmem:[%s3787_s28 + $0x190] sm:$0xff] %vm391_vm0, %v2253_v47 }
 0x24b   : > { %2707 = vst.msk [vmem:[%s3787_s28 + $0x18f] sm:$0xfe] %vm1762_vm9, %v2253_v47 }
 0x24c   : > { %2708 = vst.msk [vmem:[%s3787_s28 + $0x197] sm:$0xff] %vm769_vm3, %v2258_v41  ;;  %v2888_v43 = vpop.f32.mrf.mxu0 }
 0x24d   : > { %v1697_v45 = vadd.f32 %v2888_v43, %v3782_v48 }
 0x24e   : > { %v1691_v58 = vpop.f32.mrf.mxu0 }
 0x24f   : > { %v1692_v38 = vadd.f32 %v3782_v48, %v1691_v58 }
 0x250   : > { %v2961_v49 = vpop.f32.mrf.mxu1 }
 0x251   : > { %1757 = vst.msk [vmem:[%s3787_s28 + $0x1a8] sm:$0xff] %vm391_vm0, %v1692_v38  ;;  %v2268_v51 = vadd.f32 %v2961_v49, %v3782_v48 }
 0x252   : > { %1803 = vst.msk [vmem:[%s3787_s28 + $0x1a7] sm:$0xff] %vm769_vm3, %v1692_v38  ;;  %v2262_v53 = vpop.f32.mrf.mxu1 }
 0x253   : > { %1804 = vst.msk [vmem:[%s3787_s28 + $0x1af] sm:$0x1] %vm772_vm7, %v1697_v45  ;;  %v2263_v55 = vadd.f32 %v3782_v48, %v2262_v53 }
 0x254   : > { %2665 = vst.msk [vmem:[%s3787_s28 + $0x1b0] sm:$0xff] %vm391_vm0, %v2268_v51 }
 0x255   : > { %2710 = vst.msk [vmem:[%s3787_s28 + $0x1af] sm:$0xfe] %vm1762_vm9, %v2268_v51 }
 0x256   : > { %2709 = vst.msk [vmem:[%s3787_s28 + $0x19f] sm:$0x1] %vm772_vm7, %v2263_v55 }
 0x257   : > { %v2891_v57 = vpop.f32.mrf.mxu0 }
 0x258   : > { %v1707_v60 = vadd.f32 %v2891_v57, %v3782_v48 }
 0x259   : > { %v1701_v59 = vpop.f32.mrf.mxu0 }
 0x25a   : > { %1759 = vst.msk [vmem:[%s3787_s28 + $0x1c8] sm:$0xff] %vm391_vm0, %v1707_v60  ;;  %v1702_v61 = vadd.f32 %v3782_v48, %v1701_v59 }
 0x25b   : > { %v2964_v62 = vpop.f32.mrf.mxu1 }
 0x25c   : > { %1758 = vst.msk [vmem:[%s3787_s28 + $0x1c0] sm:$0xff] %vm391_vm0, %v1702_v61  ;;  %v2278_v1 = vadd.f32 %v2964_v62, %v3782_v48 }
 0x25d   : > { %1805 = vst.msk [vmem:[%s3787_s28 + $0x1bf] sm:$0xfe] %vm1762_vm9, %v1702_v61  ;;  %v2272_v39 = vpop.f32.mrf.mxu1 }
 0x25e   : > { %1806 = vst.msk [vmem:[%s3787_s28 + $0x1c7] sm:$0xff] %vm769_vm3, %v1707_v60  ;;  %v2273_v63 = vadd.f32 %v3782_v48, %v2272_v39 }
 0x260   : > { %2666 = vst.msk [vmem:[%s3787_s28 + $0x1b8] sm:$0xff] %vm391_vm0, %v2273_v63 }
 0x261   : > { %2711 = vst.msk [vmem:[%s3787_s28 + $0x1b7] sm:$0xff] %vm769_vm3, %v2273_v63  ;;  %v2894_v42 = vpop.f32.mrf.mxu0 }
 0x262   : > { %2712 = vst.msk [vmem:[%s3787_s28 + $0x1bf] sm:$0x1] %vm772_vm7, %v2278_v1  ;;  %v1717_v3 = vadd.f32 %v2894_v42, %v3782_v48 }
 0x263   : > { %v1711_v5 = vpop.f32.mrf.mxu0 }
 0x264   : > { %1760 = vst.msk [vmem:[%s3787_s28 + $0x1e0] sm:$0xff] %vm391_vm0, %v1717_v3  ;;  %v1712_v0 = vadd.f32 %v3782_v48, %v1711_v5 }
 0x265   : > { %1808 = vst.msk [vmem:[%s3787_s28 + $0x1df] sm:$0xfe] %vm1762_vm9, %v1717_v3 }
 0x266   : > { %1807 = vst.msk [vmem:[%s3787_s28 + $0x1cf] sm:$0x1] %vm772_vm7, %v1712_v0 }
 0x269   : > { %v2967_v6 = vpop.f32.mrf.mxu1 }
 0x26a   : > { %v2288_v7 = vadd.f32 %v2967_v6, %v3782_v48 }
 0x26b   : > { %v2282_v2 = vpop.f32.mrf.mxu1 }
 0x26c   : > { %2668 = vst.msk [vmem:[%s3787_s28 + $0x1d8] sm:$0xff] %vm391_vm0, %v2288_v7  ;;  %v2283_v9 = vadd.f32 %v3782_v48, %v2282_v2 }
 0x26d   : > { %v2897_v10 = vpop.f32.mrf.mxu0 }
 0x26e   : > { %2667 = vst.msk [vmem:[%s3787_s28 + $0x1d0] sm:$0xff] %vm391_vm0, %v2283_v9  ;;  %v1727_v44 = vadd.f32 %v2897_v10, %v3782_v48 }
 0x26f   : > { %2713 = vst.msk [vmem:[%s3787_s28 + $0x1cf] sm:$0xfe] %vm1762_vm9, %v2283_v9  ;;  %v1721_v11 = vpop.f32.mrf.mxu0 }
 0x270   : > { %2714 = vst.msk [vmem:[%s3787_s28 + $0x1d7] sm:$0xff] %vm769_vm3, %v2288_v7  ;;  %v1722_v13 = vadd.f32 %v3782_v48, %v1721_v11 }
 0x272   : > { %v2970_v46 = vpop.f32.mrf.mxu1  ;;  %1761 = vst.msk [vmem:[%s3787_s28 + $0x1e8] sm:$0xff] %vm391_vm0, %v1722_v13 }
 0x273   : > { %v2298_v4 = vadd.f32 %v2970_v46, %v3782_v48  ;;  %1809 = vst.msk [vmem:[%s3787_s28 + $0x1e7] sm:$0xff] %vm769_vm3, %v1722_v13 }
 0x274   : > { %1810 = vst.msk [vmem:[%s3787_s28 + $0x1ef] sm:$0x1] %vm772_vm7, %v1727_v44  ;;  %v2292_v14 = vpop.f32.mrf.mxu1 }
 0x275   : > { %2669 = vst.msk [vmem:[%s3787_s28 + $0x1f0] sm:$0xff] %vm391_vm0, %v2298_v4  ;;  %v2293_v15 = vadd.f32 %v3782_v48, %v2292_v14 }
 0x276   : > { %2716 = vst.msk [vmem:[%s3787_s28 + $0x1ef] sm:$0xfe] %vm1762_vm9, %v2298_v4 }
 0x277   : > { %2715 = vst.msk [vmem:[%s3787_s28 + $0x1df] sm:$0x1] %vm772_vm7, %v2293_v15 }
 0x27d   : > { %v2973_v8 = vpop.f32.mrf.mxu1 }
 0x27e   : > { %v2308_v19 = vadd.f32 %v2973_v8, %v3782_v48 }
 0x27f   : > { %v2302_v16 = vpop.f32.mrf.mxu1 }
 0x280   : > { %v2303_v17 = vadd.f32 %v3782_v48, %v2302_v16 }
 0x282   : > { %2670 = vst.msk [vmem:[%s3787_s28 + $0x1f8] sm:$0xff] %vm391_vm0, %v2303_v17 }
 0x283   : > { %2717 = vst.msk [vmem:[%s3787_s28 + $0x1f7] sm:$0xff] %vm769_vm3, %v2303_v17 }
 0x284   : > { %2718 = vst.msk [vmem:[%s3787_s28 + $0x1ff] sm:$0x1] %vm772_vm7, %v2308_v19 }
 0x285 PF: > { %s15_s20 = sadd.s32 1, %s3025_s20   ;;  %s4292_s18 = smov %s3021_s19 }
 0x286   : > { %p12_p5 = scmp.ge.s32.totalorder %s15_s20, 4   ;;  %s4293_s19 = smov %s4295_s21 }
 0x288   :  { %14 = sbr.rel (!%p12_p5) target bundleno = 2 (0x2), region = 80 }

</bundles_post_ra>
